<compile_context>
chip_gen: v5e
topology: v5e:2x2
jax: 0.10.0
libtpu: 0.0.40
codegen_flags: <defaults>
</compile_context>

<pallas_src>
import functools

import jax
import jax.numpy as jnp
from jax import lax
from jax.experimental import pallas as pl
from jax.experimental.pallas import tpu as pltpu

# ----------------------------------------------------------------------------
# Configuration (mirrors the module's __init__)
# ----------------------------------------------------------------------------
NUM_OBJECTS = 24          # len(obs_norms) in the module
CNN_CHANNELS = 32         # cfg.cnn_channels
OUTPUT_DIM = 32           # fc_cfg.output_dim
H = W = 11                # spatial size implied by Linear(cnn_channels, ...)
K1 = NUM_OBJECTS * 5 * 5  # im2col patch length for conv1 = 600
P1 = 3 * 3                # conv1 output spatial positions = 9

OBS_NORMS = [1, 1, 1, 255, 1, 1, 5, 5, 5, 1, 10, 1,
             30, 30, 1, 1, 30, 5, 5, 100, 1, 1, 30, 1]

# TODO(synk): cfg.auto_normalize / FeatureListNormalizer (running-stat
# normalizer, external class) is not implemented; auto_normalize=False here.


# ----------------------------------------------------------------------------
# Pallas kernel: one batch TILE (TB elements) per grid step.
# ----------------------------------------------------------------------------
def agent_kernel(patches_ref,   # (P1, TB, K1) bf16 tap-major im2col patches
                 w1_ref,        # (K1, C)      bf16 conv1 weights (obs_norm folded)
                 b1_ref,        # (1, C)       f32
                 w2_ref,        # (P1*C, C)    bf16 conv2 weights, tap-major rows
                 b2_ref,        # (1, C)       f32
                 w3_ref,        # (C, D)       bf16 linear weights (transposed)
                 b3_ref,        # (1, D)       f32
                 out_ref):      # (TB, D)      f32
    tb = patches_ref.shape[1]
    c = w1_ref.shape[1]

    w1 = w1_ref[...]
    # Hoist the bias broadcast out of the tap unroll (JAX doesn't CSE it).
    b1b = jnp.broadcast_to(b1_ref[...], (tb, c))

    # Conv1 (k=5, s=3) + ReLU and Conv2 (k=3, s=1 -> 1x1 output) fused as a
    # tap-sum: for each of the 9 conv1 output positions p, compute the conv1
    # activations for the whole batch tile and contract them with the matching
    # conv2 tap. Partials are reduced with a balanced tree (no 9-deep serial
    # dependency chain). Everything accumulates in f32 on the MXU.
    partials = []
    for p in range(P1):                                   # static unroll (9)
        h1 = jnp.dot(patches_ref[p], w1,
                     preferred_element_type=jnp.float32)  # [TB, C] f32
        h1 = jnp.maximum(h1 + b1b, 0.0).astype(jnp.bfloat16)
        partials.append(jnp.dot(h1, w2_ref[p * c:(p + 1) * c, :],
                                preferred_element_type=jnp.float32))
    while len(partials) > 1:                              # balanced tree-sum
        nxt = [partials[i] + partials[i + 1]
               for i in range(0, len(partials) - 1, 2)]
        if len(partials) % 2:
            nxt.append(partials[-1])
        partials = nxt
    h2 = jnp.maximum(partials[0] + b2_ref[...], 0.0)      # [TB, C] f32

    # Flatten (trivial: spatial is 1x1) + Linear + ReLU.
    h3 = jnp.dot(h2.astype(jnp.bfloat16), w3_ref[...],
                 preferred_element_type=jnp.float32)
    out_ref[...] = jnp.maximum(h3 + b3_ref[...], 0.0)     # [TB, D]


# ----------------------------------------------------------------------------
# Wrapper: parameter layout + im2col glue + pallas_call
# ----------------------------------------------------------------------------
def _round_up(x, m):
    return -(-x // m) * m


def _im2col_conv1_tap_major(obs):
    """obs: [B, C_in, 11, 11] -> tap-major patches [9, B, C_in*25] (same dtype)."""
    B, Cin = obs.shape[0], obs.shape[1]
    cols = []
    for oh in range(3):
        for ow in range(3):
            patch = obs[:, :, 3 * oh:3 * oh + 5, 3 * ow:3 * ow + 5]
            cols.append(patch.reshape(B, Cin * 25))
    return jnp.stack(cols, axis=0)


def _fold_params(W1, b1, W2, b2, W3, b3, obs_norm):
    """Weight layout transforms; obs_norm folded into w1; weights -> bf16."""
    norm_vec = jnp.repeat(obs_norm.astype(jnp.float32), 25)          # [K1]
    w1 = (W1.transpose(1, 2, 3, 0).reshape(K1, CNN_CHANNELS)
          / norm_vec[:, None]).astype(jnp.bfloat16)                  # [K1, C]
    w2 = (W2.transpose(2, 3, 1, 0)
          .reshape(P1 * CNN_CHANNELS, CNN_CHANNELS)).astype(jnp.bfloat16)
    w3 = W3.T.astype(jnp.bfloat16)                                   # [C, D]
    return (w1, b1.reshape(1, -1).astype(jnp.float32),
            w2, b2.reshape(1, -1).astype(jnp.float32),
            w3, b3.reshape(1, -1).astype(jnp.float32))


@functools.partial(jax.jit, static_argnames=("block_b",))
def simple_conv_agent_forward(obs, W1, b1, W2, b2, W3, b3, obs_norm,
                              *, block_b=512):
    B = obs.shape[0]
    D = OUTPUT_DIM

    # Batch tile: multiple of 8 (sublane), capped at block_b (VMEM: bf16
    # patches are ~10.5 MiB double-buffered at TB=512 — safe on v5e/v6e/v7x;
    # 1024 is also fine on v5e/v6e). Clamp so the grid has >= 2 steps when
    # possible, so both v7x TensorCores get work.
    block_cap = max(8, (block_b // 8) * 8)
    TB = min(block_cap, max(8, _round_up(-(-B // 2), 8)))
    nb = -(-B // TB)           # ceil div
    Bp = nb * TB

    # Glue: pad the (small, bf16) obs BEFORE im2col so we never copy/pad the
    # inflated patches tensor; patches are emitted directly in bf16.
    obs_bf = obs.astype(jnp.bfloat16)
    if Bp != B:
        obs_bf = jnp.pad(obs_bf, ((0, Bp - B), (0, 0), (0, 0), (0, 0)))
    patches = _im2col_conv1_tap_major(obs_bf)                        # [9,Bp,K1]
    # TODO(synk): int8 (v5e/v6e) / fp8 (v7x) patches would halve HBM traffic
    # again but is accuracy-dependent; not applied here.

    w1, b1r, w2, b2r, w3, b3r = _fold_params(W1, b1, W2, b2, W3, b3, obs_norm)

    out = pl.pallas_call(
        agent_kernel,
        out_shape=jax.ShapeDtypeStruct((Bp, D), jnp.float32),
        grid_spec=pltpu.PrefetchScalarGridSpec(
            num_scalar_prefetch=0,
            grid=(nb,),
            in_specs=[
                pl.BlockSpec((P1, TB, K1), lambda b: (0, b, 0)),        # patches
                pl.BlockSpec((K1, CNN_CHANNELS), lambda b: (0, 0)),     # w1
                pl.BlockSpec((1, CNN_CHANNELS), lambda b: (0, 0)),      # b1
                pl.BlockSpec((P1 * CNN_CHANNELS, CNN_CHANNELS),
                             lambda b: (0, 0)),                         # w2
                pl.BlockSpec((1, CNN_CHANNELS), lambda b: (0, 0)),      # b2
                pl.BlockSpec((CNN_CHANNELS, D), lambda b: (0, 0)),      # w3
                pl.BlockSpec((1, D), lambda b: (0, 0)),                 # b3
            ],
            out_specs=pl.BlockSpec((TB, D), lambda b: (b, 0)),
        ),
        compiler_params=pltpu.CompilerParams(
            dimension_semantics=("parallel",),
            vmem_limit_bytes=32 * 1024 * 1024),
    )(patches, w1, b1r, w2, b2r, w3, b3r)

    return out[:B]


# ----------------------------------------------------------------------------
# References (for correctness checks)
# ----------------------------------------------------------------------------
def reference_forward(obs, W1, b1, W2, b2, W3, b3, obs_norm):
    """Pure-JAX f32 reference (the original module's semantics)."""
    x = obs / obs_norm.reshape(1, -1, 1, 1)
    dn = ('NCHW', 'OIHW', 'NCHW')
    y = lax.conv_general_dilated(x, W1, (3, 3), 'VALID', dimension_numbers=dn)
    y = jax.nn.relu(y + b1.reshape(1, -1, 1, 1))
    y = lax.conv_general_dilated(y, W2, (1, 1), 'VALID', dimension_numbers=dn)
    y = jax.nn.relu(y + b2.reshape(1, -1, 1, 1))
    y = y.reshape(y.shape[0], -1)
    y = jax.nn.relu(y @ W3.T + b3)
    return y


def emulated_bf16_forward(obs, W1, b1, W2, b2, W3, b3, obs_norm):
    """Same math as the kernel (bf16 operands, f32 accumulation), pure JAX."""
    patches = _im2col_conv1_tap_major(obs.astype(jnp.bfloat16))      # [9,B,K1]
    w1, b1r, w2, b2r, w3, b3r = _fold_params(W1, b1, W2, b2, W3, b3, obs_norm)
    h1 = jnp.einsum('pbk,kc->pbc', patches, w1,
                    preferred_element_type=jnp.float32)
    h1 = jnp.maximum(h1 + b1r.reshape(1, 1, -1), 0.0).astype(jnp.bfloat16)
    w2_3 = w2.reshape(P1, CNN_CHANNELS, CNN_CHANNELS)
    h2 = jnp.einsum('pbc,pcd->bd', h1, w2_3,
                    preferred_element_type=jnp.float32)
    h2 = jnp.maximum(h2 + b2r, 0.0).astype(jnp.bfloat16)
    h3 = jnp.dot(h2, w3, preferred_element_type=jnp.float32)
    return jnp.maximum(h3 + b3r, 0.0)


# ----------------------------------------------------------------------------
# Main
# ----------------------------------------------------------------------------
if __name__ == "__main__":
    key = jax.random.PRNGKey(0)
    k_obs, k_w1, k_b1, k_w2, k_b2, k_w3, k_b3 = jax.random.split(key, 7)

    B = 2
    obs = jax.random.uniform(k_obs, (B, NUM_OBJECTS, H, W),
                             dtype=jnp.float32, maxval=5.0)

    # Deterministic synthetic parameters (module's layer_init shapes).
    W1 = 0.05 * jax.random.normal(k_w1, (CNN_CHANNELS, NUM_OBJECTS, 5, 5),
                                  dtype=jnp.float32)
    b1 = 0.01 * jax.random.normal(k_b1, (CNN_CHANNELS,), dtype=jnp.float32)
    W2 = 0.05 * jax.random.normal(k_w2, (CNN_CHANNELS, CNN_CHANNELS, 3, 3),
                                  dtype=jnp.float32)
    b2 = 0.01 * jax.random.normal(k_b2, (CNN_CHANNELS,), dtype=jnp.float32)
    W3 = 0.05 * jax.random.normal(k_w3, (OUTPUT_DIM, CNN_CHANNELS),
                                  dtype=jnp.float32)
    b3 = 0.01 * jax.random.normal(k_b3, (OUTPUT_DIM,), dtype=jnp.float32)

    obs_norm = jnp.asarray(OBS_NORMS, dtype=jnp.float32)

    # Small-batch check (single grid step).
    out = simple_conv_agent_forward(obs, W1, b1, W2, b2, W3, b3, obs_norm)
    out = jax.block_until_ready(out)
    assert out.shape == (B, OUTPUT_DIM), out.shape

    # Tight check: kernel vs. the same bf16/f32-acc math in pure JAX.
    emu = emulated_bf16_forward(obs, W1, b1, W2, b2, W3, b3, obs_norm)
    emu = jax.block_until_ready(emu)
    assert jnp.allclose(out, emu, rtol=2e-3, atol=2e-3), (
        f"bf16-emulated max abs err {jnp.max(jnp.abs(out - emu))}")

    # Loose semantic check: kernel vs. the f32 module reference (bf16 inputs
    # cost ~2-3 bits over the 600-long contraction).
    ref = reference_forward(obs, W1, b1, W2, b2, W3, b3, obs_norm)
    ref = jax.block_until_ready(ref)
    assert jnp.allclose(out, ref, rtol=1e-1, atol=1e-1), (
        f"f32-reference max abs err {jnp.max(jnp.abs(out - ref))}")

    # Multi-step check: exercises batch tiling + padding (B=20, TB=8 -> 3 steps).
    B2 = 20
    obs2 = jax.random.uniform(jax.random.PRNGKey(1),
                              (B2, NUM_OBJECTS, H, W),
                              dtype=jnp.float32, maxval=5.0)
    out2 = simple_conv_agent_forward(obs2, W1, b1, W2, b2, W3, b3, obs_norm,
                                     block_b=8)
    out2 = jax.block_until_ready(out2)
    emu2 = emulated_bf16_forward(obs2, W1, b1, W2, b2, W3, b3, obs_norm)
    ref2 = reference_forward(obs2, W1, b1, W2, b2, W3, b3, obs_norm)
    assert out2.shape == (B2, OUTPUT_DIM), out2.shape
    assert jnp.allclose(out2, emu2, rtol=2e-3, atol=2e-3), (
        f"bf16-emulated max abs err {jnp.max(jnp.abs(out2 - emu2))}")
    assert jnp.allclose(out2, ref2, rtol=1e-1, atol=1e-1), (
        f"f32-reference max abs err {jnp.max(jnp.abs(out2 - ref2))}")

    print("KERNEL_OK")
</pallas_src>

<mosaic_0001>
module attributes {stable_mosaic.version = 11 : i64} {
  func.func @agent_kernel(%arg0: i32, %arg1: memref<9x8x600xbf16, #tpu.memory_space<vmem>>, %arg2: memref<600x32xbf16, #tpu.memory_space<vmem>>, %arg3: memref<1x32xf32, #tpu.memory_space<vmem>>, %arg4: memref<288x32xbf16, #tpu.memory_space<vmem>>, %arg5: memref<1x32xf32, #tpu.memory_space<vmem>>, %arg6: memref<32x32xbf16, #tpu.memory_space<vmem>>, %arg7: memref<1x32xf32, #tpu.memory_space<vmem>>, %arg8: memref<8x32xf32, #tpu.memory_space<vmem>>) attributes {dimension_semantics = [#tpu.dimension_semantics<parallel>], iteration_bounds = array<i64: 1>, scalar_prefetch = 0 : i64, scratch_operands = 0 : i64, tpu.core_type = #tpu.core_type<tc>, window_params = [{transform_indices = @transform_0, window_bounds = array<i64: 9, 8, 600>}, {pipeline_mode = #tpu.pipeline_mode<synchronous>, transform_indices = @transform_1, window_bounds = array<i64: 600, 32>}, {pipeline_mode = #tpu.pipeline_mode<synchronous>, transform_indices = @transform_2, window_bounds = array<i64: 1, 32>}, {pipeline_mode = #tpu.pipeline_mode<synchronous>, transform_indices = @transform_3, window_bounds = array<i64: 288, 32>}, {pipeline_mode = #tpu.pipeline_mode<synchronous>, transform_indices = @transform_4, window_bounds = array<i64: 1, 32>}, {pipeline_mode = #tpu.pipeline_mode<synchronous>, transform_indices = @transform_5, window_bounds = array<i64: 32, 32>}, {pipeline_mode = #tpu.pipeline_mode<synchronous>, transform_indices = @transform_6, window_bounds = array<i64: 1, 32>}, {transform_indices = @transform_7, window_bounds = array<i64: 8, 32>}]} {
    %c0 = arith.constant 0 : index
    %c0_0 = arith.constant 0 : index
    %0 = vector.load %arg2[%c0, %c0_0] : memref<600x32xbf16, #tpu.memory_space<vmem>>, vector<600x32xbf16>
    %c0_1 = arith.constant 0 : index
    %c0_2 = arith.constant 0 : index
    %1 = vector.load %arg3[%c0_1, %c0_2] : memref<1x32xf32, #tpu.memory_space<vmem>>, vector<1x32xf32>
    %2 = vector.shape_cast %1 : vector<1x32xf32> to vector<1x32xf32>
    %3 = vector.broadcast %2 : vector<1x32xf32> to vector<8x32xf32>
    %c0_3 = arith.constant 0 : index
    %c0_4 = arith.constant 0 : index
    %c0_5 = arith.constant 0 : index
    %4 = vector.load %arg1[%c0_3, %c0_4, %c0_5] : memref<9x8x600xbf16, #tpu.memory_space<vmem>>, vector<1x8x600xbf16>
    %5 = vector.shape_cast %4 : vector<1x8x600xbf16> to vector<8x600xbf16>
    %cst = arith.constant dense<0.000000e+00> : vector<8x32xf32>
    %6 = tpu.matmul %5, %0, %cst {dimension_numbers = #tpu.dot_dimension_numbers<[1], [0], [0], [1], [0, 0, 1, 1], [], []>} : vector<8x600xbf16>, vector<600x32xbf16>, vector<8x32xf32> -> vector<8x32xf32>
    %7 = arith.addf %6, %3 : vector<8x32xf32>
    %cst_6 = arith.constant 0.000000e+00 : f32
    %8 = vector.broadcast %cst_6 : f32 to vector<8x32xf32>
    %9 = arith.maximumf %7, %8 : vector<8x32xf32>
    %10 = arith.truncf %9 : vector<8x32xf32> to vector<8x32xbf16>
    %c0_7 = arith.constant 0 : index
    %c0_8 = arith.constant 0 : index
    %11 = vector.load %arg4[%c0_7, %c0_8] : memref<288x32xbf16, #tpu.memory_space<vmem>>, vector<32x32xbf16>
    %cst_9 = arith.constant dense<0.000000e+00> : vector<8x32xf32>
    %12 = tpu.matmul %10, %11, %cst_9 {dimension_numbers = #tpu.dot_dimension_numbers<[1], [0], [0], [1], [0, 0, 1, 1], [], []>} : vector<8x32xbf16>, vector<32x32xbf16>, vector<8x32xf32> -> vector<8x32xf32>
    %c1 = arith.constant 1 : index
    %c0_10 = arith.constant 0 : index
    %c0_11 = arith.constant 0 : index
    %13 = vector.load %arg1[%c1, %c0_10, %c0_11] : memref<9x8x600xbf16, #tpu.memory_space<vmem>>, vector<1x8x600xbf16>
    %14 = vector.shape_cast %13 : vector<1x8x600xbf16> to vector<8x600xbf16>
    %cst_12 = arith.constant dense<0.000000e+00> : vector<8x32xf32>
    %15 = tpu.matmul %14, %0, %cst_12 {dimension_numbers = #tpu.dot_dimension_numbers<[1], [0], [0], [1], [0, 0, 1, 1], [], []>} : vector<8x600xbf16>, vector<600x32xbf16>, vector<8x32xf32> -> vector<8x32xf32>
    %16 = arith.addf %15, %3 : vector<8x32xf32>
    %cst_13 = arith.constant 0.000000e+00 : f32
    %17 = vector.broadcast %cst_13 : f32 to vector<8x32xf32>
    %18 = arith.maximumf %16, %17 : vector<8x32xf32>
    %19 = arith.truncf %18 : vector<8x32xf32> to vector<8x32xbf16>
    %c32 = arith.constant 32 : index
    %c0_14 = arith.constant 0 : index
    %20 = vector.load %arg4[%c32, %c0_14] : memref<288x32xbf16, #tpu.memory_space<vmem>>, vector<32x32xbf16>
    %cst_15 = arith.constant dense<0.000000e+00> : vector<8x32xf32>
    %21 = tpu.matmul %19, %20, %cst_15 {dimension_numbers = #tpu.dot_dimension_numbers<[1], [0], [0], [1], [0, 0, 1, 1], [], []>} : vector<8x32xbf16>, vector<32x32xbf16>, vector<8x32xf32> -> vector<8x32xf32>
    %c2 = arith.constant 2 : index
    %c0_16 = arith.constant 0 : index
    %c0_17 = arith.constant 0 : index
    %22 = vector.load %arg1[%c2, %c0_16, %c0_17] : memref<9x8x600xbf16, #tpu.memory_space<vmem>>, vector<1x8x600xbf16>
    %23 = vector.shape_cast %22 : vector<1x8x600xbf16> to vector<8x600xbf16>
    %cst_18 = arith.constant dense<0.000000e+00> : vector<8x32xf32>
    %24 = tpu.matmul %23, %0, %cst_18 {dimension_numbers = #tpu.dot_dimension_numbers<[1], [0], [0], [1], [0, 0, 1, 1], [], []>} : vector<8x600xbf16>, vector<600x32xbf16>, vector<8x32xf32> -> vector<8x32xf32>
    %25 = arith.addf %24, %3 : vector<8x32xf32>
    %cst_19 = arith.constant 0.000000e+00 : f32
    %26 = vector.broadcast %cst_19 : f32 to vector<8x32xf32>
    %27 = arith.maximumf %25, %26 : vector<8x32xf32>
    %28 = arith.truncf %27 : vector<8x32xf32> to vector<8x32xbf16>
    %c64 = arith.constant 64 : index
    %c0_20 = arith.constant 0 : index
    %29 = vector.load %arg4[%c64, %c0_20] : memref<288x32xbf16, #tpu.memory_space<vmem>>, vector<32x32xbf16>
    %cst_21 = arith.constant dense<0.000000e+00> : vector<8x32xf32>
    %30 = tpu.matmul %28, %29, %cst_21 {dimension_numbers = #tpu.dot_dimension_numbers<[1], [0], [0], [1], [0, 0, 1, 1], [], []>} : vector<8x32xbf16>, vector<32x32xbf16>, vector<8x32xf32> -> vector<8x32xf32>
    %c3 = arith.constant 3 : index
    %c0_22 = arith.constant 0 : index
    %c0_23 = arith.constant 0 : index
    %31 = vector.load %arg1[%c3, %c0_22, %c0_23] : memref<9x8x600xbf16, #tpu.memory_space<vmem>>, vector<1x8x600xbf16>
    %32 = vector.shape_cast %31 : vector<1x8x600xbf16> to vector<8x600xbf16>
    %cst_24 = arith.constant dense<0.000000e+00> : vector<8x32xf32>
    %33 = tpu.matmul %32, %0, %cst_24 {dimension_numbers = #tpu.dot_dimension_numbers<[1], [0], [0], [1], [0, 0, 1, 1], [], []>} : vector<8x600xbf16>, vector<600x32xbf16>, vector<8x32xf32> -> vector<8x32xf32>
    %34 = arith.addf %33, %3 : vector<8x32xf32>
    %cst_25 = arith.constant 0.000000e+00 : f32
    %35 = vector.broadcast %cst_25 : f32 to vector<8x32xf32>
    %36 = arith.maximumf %34, %35 : vector<8x32xf32>
    %37 = arith.truncf %36 : vector<8x32xf32> to vector<8x32xbf16>
    %c96 = arith.constant 96 : index
    %c0_26 = arith.constant 0 : index
    %38 = vector.load %arg4[%c96, %c0_26] : memref<288x32xbf16, #tpu.memory_space<vmem>>, vector<32x32xbf16>
    %cst_27 = arith.constant dense<0.000000e+00> : vector<8x32xf32>
    %39 = tpu.matmul %37, %38, %cst_27 {dimension_numbers = #tpu.dot_dimension_numbers<[1], [0], [0], [1], [0, 0, 1, 1], [], []>} : vector<8x32xbf16>, vector<32x32xbf16>, vector<8x32xf32> -> vector<8x32xf32>
    %c4 = arith.constant 4 : index
    %c0_28 = arith.constant 0 : index
    %c0_29 = arith.constant 0 : index
    %40 = vector.load %arg1[%c4, %c0_28, %c0_29] : memref<9x8x600xbf16, #tpu.memory_space<vmem>>, vector<1x8x600xbf16>
    %41 = vector.shape_cast %40 : vector<1x8x600xbf16> to vector<8x600xbf16>
    %cst_30 = arith.constant dense<0.000000e+00> : vector<8x32xf32>
    %42 = tpu.matmul %41, %0, %cst_30 {dimension_numbers = #tpu.dot_dimension_numbers<[1], [0], [0], [1], [0, 0, 1, 1], [], []>} : vector<8x600xbf16>, vector<600x32xbf16>, vector<8x32xf32> -> vector<8x32xf32>
    %43 = arith.addf %42, %3 : vector<8x32xf32>
    %cst_31 = arith.constant 0.000000e+00 : f32
    %44 = vector.broadcast %cst_31 : f32 to vector<8x32xf32>
    %45 = arith.maximumf %43, %44 : vector<8x32xf32>
    %46 = arith.truncf %45 : vector<8x32xf32> to vector<8x32xbf16>
    %c128 = arith.constant 128 : index
    %c0_32 = arith.constant 0 : index
    %47 = vector.load %arg4[%c128, %c0_32] : memref<288x32xbf16, #tpu.memory_space<vmem>>, vector<32x32xbf16>
    %cst_33 = arith.constant dense<0.000000e+00> : vector<8x32xf32>
    %48 = tpu.matmul %46, %47, %cst_33 {dimension_numbers = #tpu.dot_dimension_numbers<[1], [0], [0], [1], [0, 0, 1, 1], [], []>} : vector<8x32xbf16>, vector<32x32xbf16>, vector<8x32xf32> -> vector<8x32xf32>
    %c5 = arith.constant 5 : index
    %c0_34 = arith.constant 0 : index
    %c0_35 = arith.constant 0 : index
    %49 = vector.load %arg1[%c5, %c0_34, %c0_35] : memref<9x8x600xbf16, #tpu.memory_space<vmem>>, vector<1x8x600xbf16>
    %50 = vector.shape_cast %49 : vector<1x8x600xbf16> to vector<8x600xbf16>
    %cst_36 = arith.constant dense<0.000000e+00> : vector<8x32xf32>
    %51 = tpu.matmul %50, %0, %cst_36 {dimension_numbers = #tpu.dot_dimension_numbers<[1], [0], [0], [1], [0, 0, 1, 1], [], []>} : vector<8x600xbf16>, vector<600x32xbf16>, vector<8x32xf32> -> vector<8x32xf32>
    %52 = arith.addf %51, %3 : vector<8x32xf32>
    %cst_37 = arith.constant 0.000000e+00 : f32
    %53 = vector.broadcast %cst_37 : f32 to vector<8x32xf32>
    %54 = arith.maximumf %52, %53 : vector<8x32xf32>
    %55 = arith.truncf %54 : vector<8x32xf32> to vector<8x32xbf16>
    %c160 = arith.constant 160 : index
    %c0_38 = arith.constant 0 : index
    %56 = vector.load %arg4[%c160, %c0_38] : memref<288x32xbf16, #tpu.memory_space<vmem>>, vector<32x32xbf16>
    %cst_39 = arith.constant dense<0.000000e+00> : vector<8x32xf32>
    %57 = tpu.matmul %55, %56, %cst_39 {dimension_numbers = #tpu.dot_dimension_numbers<[1], [0], [0], [1], [0, 0, 1, 1], [], []>} : vector<8x32xbf16>, vector<32x32xbf16>, vector<8x32xf32> -> vector<8x32xf32>
    %c6 = arith.constant 6 : index
    %c0_40 = arith.constant 0 : index
    %c0_41 = arith.constant 0 : index
    %58 = vector.load %arg1[%c6, %c0_40, %c0_41] : memref<9x8x600xbf16, #tpu.memory_space<vmem>>, vector<1x8x600xbf16>
    %59 = vector.shape_cast %58 : vector<1x8x600xbf16> to vector<8x600xbf16>
    %cst_42 = arith.constant dense<0.000000e+00> : vector<8x32xf32>
    %60 = tpu.matmul %59, %0, %cst_42 {dimension_numbers = #tpu.dot_dimension_numbers<[1], [0], [0], [1], [0, 0, 1, 1], [], []>} : vector<8x600xbf16>, vector<600x32xbf16>, vector<8x32xf32> -> vector<8x32xf32>
    %61 = arith.addf %60, %3 : vector<8x32xf32>
    %cst_43 = arith.constant 0.000000e+00 : f32
    %62 = vector.broadcast %cst_43 : f32 to vector<8x32xf32>
    %63 = arith.maximumf %61, %62 : vector<8x32xf32>
    %64 = arith.truncf %63 : vector<8x32xf32> to vector<8x32xbf16>
    %c192 = arith.constant 192 : index
    %c0_44 = arith.constant 0 : index
    %65 = vector.load %arg4[%c192, %c0_44] : memref<288x32xbf16, #tpu.memory_space<vmem>>, vector<32x32xbf16>
    %cst_45 = arith.constant dense<0.000000e+00> : vector<8x32xf32>
    %66 = tpu.matmul %64, %65, %cst_45 {dimension_numbers = #tpu.dot_dimension_numbers<[1], [0], [0], [1], [0, 0, 1, 1], [], []>} : vector<8x32xbf16>, vector<32x32xbf16>, vector<8x32xf32> -> vector<8x32xf32>
    %c7 = arith.constant 7 : index
    %c0_46 = arith.constant 0 : index
    %c0_47 = arith.constant 0 : index
    %67 = vector.load %arg1[%c7, %c0_46, %c0_47] : memref<9x8x600xbf16, #tpu.memory_space<vmem>>, vector<1x8x600xbf16>
    %68 = vector.shape_cast %67 : vector<1x8x600xbf16> to vector<8x600xbf16>
    %cst_48 = arith.constant dense<0.000000e+00> : vector<8x32xf32>
    %69 = tpu.matmul %68, %0, %cst_48 {dimension_numbers = #tpu.dot_dimension_numbers<[1], [0], [0], [1], [0, 0, 1, 1], [], []>} : vector<8x600xbf16>, vector<600x32xbf16>, vector<8x32xf32> -> vector<8x32xf32>
    %70 = arith.addf %69, %3 : vector<8x32xf32>
    %cst_49 = arith.constant 0.000000e+00 : f32
    %71 = vector.broadcast %cst_49 : f32 to vector<8x32xf32>
    %72 = arith.maximumf %70, %71 : vector<8x32xf32>
    %73 = arith.truncf %72 : vector<8x32xf32> to vector<8x32xbf16>
    %c224 = arith.constant 224 : index
    %c0_50 = arith.constant 0 : index
    %74 = vector.load %arg4[%c224, %c0_50] : memref<288x32xbf16, #tpu.memory_space<vmem>>, vector<32x32xbf16>
    %cst_51 = arith.constant dense<0.000000e+00> : vector<8x32xf32>
    %75 = tpu.matmul %73, %74, %cst_51 {dimension_numbers = #tpu.dot_dimension_numbers<[1], [0], [0], [1], [0, 0, 1, 1], [], []>} : vector<8x32xbf16>, vector<32x32xbf16>, vector<8x32xf32> -> vector<8x32xf32>
    %c8 = arith.constant 8 : index
    %c0_52 = arith.constant 0 : index
    %c0_53 = arith.constant 0 : index
    %76 = vector.load %arg1[%c8, %c0_52, %c0_53] : memref<9x8x600xbf16, #tpu.memory_space<vmem>>, vector<1x8x600xbf16>
    %77 = vector.shape_cast %76 : vector<1x8x600xbf16> to vector<8x600xbf16>
    %cst_54 = arith.constant dense<0.000000e+00> : vector<8x32xf32>
    %78 = tpu.matmul %77, %0, %cst_54 {dimension_numbers = #tpu.dot_dimension_numbers<[1], [0], [0], [1], [0, 0, 1, 1], [], []>} : vector<8x600xbf16>, vector<600x32xbf16>, vector<8x32xf32> -> vector<8x32xf32>
    %79 = arith.addf %78, %3 : vector<8x32xf32>
    %cst_55 = arith.constant 0.000000e+00 : f32
    %80 = vector.broadcast %cst_55 : f32 to vector<8x32xf32>
    %81 = arith.maximumf %79, %80 : vector<8x32xf32>
    %82 = arith.truncf %81 : vector<8x32xf32> to vector<8x32xbf16>
    %c256 = arith.constant 256 : index
    %c0_56 = arith.constant 0 : index
    %83 = vector.load %arg4[%c256, %c0_56] : memref<288x32xbf16, #tpu.memory_space<vmem>>, vector<32x32xbf16>
    %cst_57 = arith.constant dense<0.000000e+00> : vector<8x32xf32>
    %84 = tpu.matmul %82, %83, %cst_57 {dimension_numbers = #tpu.dot_dimension_numbers<[1], [0], [0], [1], [0, 0, 1, 1], [], []>} : vector<8x32xbf16>, vector<32x32xbf16>, vector<8x32xf32> -> vector<8x32xf32>
    %85 = arith.addf %12, %21 : vector<8x32xf32>
    %86 = arith.addf %30, %39 : vector<8x32xf32>
    %87 = arith.addf %48, %57 : vector<8x32xf32>
    %88 = arith.addf %66, %75 : vector<8x32xf32>
    %89 = arith.addf %85, %86 : vector<8x32xf32>
    %90 = arith.addf %87, %88 : vector<8x32xf32>
    %91 = arith.addf %89, %90 : vector<8x32xf32>
    %92 = arith.addf %91, %84 : vector<8x32xf32>
    %c0_58 = arith.constant 0 : index
    %c0_59 = arith.constant 0 : index
    %93 = vector.load %arg5[%c0_58, %c0_59] : memref<1x32xf32, #tpu.memory_space<vmem>>, vector<1x32xf32>
    %94 = vector.broadcast %93 : vector<1x32xf32> to vector<8x32xf32>
    %95 = arith.addf %92, %94 : vector<8x32xf32>
    %cst_60 = arith.constant 0.000000e+00 : f32
    %96 = vector.broadcast %cst_60 : f32 to vector<8x32xf32>
    %97 = arith.maximumf %95, %96 : vector<8x32xf32>
    %98 = arith.truncf %97 : vector<8x32xf32> to vector<8x32xbf16>
    %c0_61 = arith.constant 0 : index
    %c0_62 = arith.constant 0 : index
    %99 = vector.load %arg6[%c0_61, %c0_62] : memref<32x32xbf16, #tpu.memory_space<vmem>>, vector<32x32xbf16>
    %cst_63 = arith.constant dense<0.000000e+00> : vector<8x32xf32>
    %100 = tpu.matmul %98, %99, %cst_63 {dimension_numbers = #tpu.dot_dimension_numbers<[1], [0], [0], [1], [0, 0, 1, 1], [], []>} : vector<8x32xbf16>, vector<32x32xbf16>, vector<8x32xf32> -> vector<8x32xf32>
    %c0_64 = arith.constant 0 : index
    %c0_65 = arith.constant 0 : index
    %101 = vector.load %arg7[%c0_64, %c0_65] : memref<1x32xf32, #tpu.memory_space<vmem>>, vector<1x32xf32>
    %102 = vector.broadcast %101 : vector<1x32xf32> to vector<8x32xf32>
    %103 = arith.addf %100, %102 : vector<8x32xf32>
    %cst_66 = arith.constant 0.000000e+00 : f32
    %104 = vector.broadcast %cst_66 : f32 to vector<8x32xf32>
    %105 = arith.maximumf %103, %104 : vector<8x32xf32>
    %c0_67 = arith.constant 0 : index
    %c0_68 = arith.constant 0 : index
    %106 = vector.load %arg8[%c0_67, %c0_68] : memref<8x32xf32, #tpu.memory_space<vmem>>, vector<8x32xf32>
    tpu.vector_store %arg8[%c0_67, %c0_68], %105 {strides = array<i32>} : memref<8x32xf32, #tpu.memory_space<vmem>>, vector<8x32xf32>,
    return
  }
  func.func @transform_0(%arg0: i32) -> (i32, i32, i32) {
    %c0_i32 = arith.constant 0 : i32
    %c0_i32_0 = arith.constant 0 : i32
    %c0_i32_1 = arith.constant 0 : i32
    return %c0_i32, %arg0, %c0_i32_0 : i32, i32, i32
  }
  func.func @transform_1(%arg0: i32) -> (i32, i32) {
    %c0_i32 = arith.constant 0 : i32
    %c0_i32_0 = arith.constant 0 : i32
    %c0_i32_1 = arith.constant 0 : i32
    return %c0_i32, %c0_i32_0 : i32, i32
  }
  func.func @transform_2(%arg0: i32) -> (i32, i32) {
    %c0_i32 = arith.constant 0 : i32
    %c0_i32_0 = arith.constant 0 : i32
    %c0_i32_1 = arith.constant 0 : i32
    return %c0_i32, %c0_i32_0 : i32, i32
  }
  func.func @transform_3(%arg0: i32) -> (i32, i32) {
    %c0_i32 = arith.constant 0 : i32
    %c0_i32_0 = arith.constant 0 : i32
    %c0_i32_1 = arith.constant 0 : i32
    return %c0_i32, %c0_i32_0 : i32, i32
  }
  func.func @transform_4(%arg0: i32) -> (i32, i32) {
    %c0_i32 = arith.constant 0 : i32
    %c0_i32_0 = arith.constant 0 : i32
    %c0_i32_1 = arith.constant 0 : i32
    return %c0_i32, %c0_i32_0 : i32, i32
  }
  func.func @transform_5(%arg0: i32) -> (i32, i32) {
    %c0_i32 = arith.constant 0 : i32
    %c0_i32_0 = arith.constant 0 : i32
    %c0_i32_1 = arith.constant 0 : i32
    return %c0_i32, %c0_i32_0 : i32, i32
  }
  func.func @transform_6(%arg0: i32) -> (i32, i32) {
    %c0_i32 = arith.constant 0 : i32
    %c0_i32_0 = arith.constant 0 : i32
    %c0_i32_1 = arith.constant 0 : i32
    return %c0_i32, %c0_i32_0 : i32, i32
  }
  func.func @transform_7(%arg0: i32) -> (i32, i32) {
    %c0_i32 = arith.constant 0 : i32
    %c0_i32_0 = arith.constant 0 : i32
    return %arg0, %c0_i32 : i32, i32
  }
}

</mosaic_0001>

<bundles_post_ra>
// kernel: div.5
= control target key start
LH: loop header
LB: loop body
LE: loop exit
PB: predicated region body
PF: predicated region fallthrough
CT: control target
= control target key end

     0   :  { %vm36_vm0 = vcmask 72704   ;;  %vm9_vm1 = vcmask 23552   ;;  %s261_s14 = smov 119   ;;  %s262_s15 = smov 125   ;;  %vm50_vm2 = vcmask 97280   ;;  %vm22_vm3 = vcmask 48128   ;;  %s462_s0 = inlined_call_operand.vmem [shape: f32[24,25], index: 0, kind: input, shape index: {}]   ;;  %s463_s1 = inlined_call_operand.vmem [shape: f32[600], index: 1, kind: output, shape index: {}]  }
   0x1   :  { %v196_v0 = vld [vmem:[%s462_s0 + $0xf] sm:$0x1]   ;;  %v189_v2 = vld [vmem:[%s462_s0 + $0x5] sm:$0x1]   ;;  %v200_v6 = vld [vmem:[%s462_s0 + $0x14] sm:$0x1]  }
   0x2   :  { %v197_v1 = vld [vmem:[%s462_s0 + $0xf] sm:$0x1]   ;;  %v190_v4 = vld [vmem:[%s462_s0 + $0x5] sm:$0x1]   ;;  %v201_v7 = vld [vmem:[%s462_s0 + $0x14] sm:$0x1]  }
   0x3   :  { %v37_v3 = vsel %vm36_vm0, %v197_v1, %v196_v0  ;;  %v10_v5 = vsel %vm9_vm1, %v190_v4, %v189_v2  ;;  %v192_v8 = vld [vmem:[%s462_s0 + $0xa] sm:$0x1]   ;;  %v204_v10 = vld [vmem:[%s462_s0 + $0x4] sm:$0x1]   ;;  %s263_s26 = smov 100   ;;  %v51_v11 = vsel %vm50_vm2, %v201_v7, %v200_v6  ;;  %s264_s27 = smov 116  }
   0x4   :  { %38 = vrot.lane.b32.xlu1 %v37_v3, %s261_s14  ;;  %11 = vrot.lane.b32.xlu0 %v10_v5, %s262_s15  ;;  %v193_v9 = vld [vmem:[%s462_s0 + $0xa] sm:$0x1]   ;;  %s265_s28 = smov 122   ;;  %v205_v13 = vld [vmem:[%s462_s0 + $0x9] sm:$0x1]   ;;  %s266_s2 = smov 97  }
   0x5   :  { %62 = vrot.lane.b32.xlu2 %v204_v10, %s263_s26  ;;  %v23_v12 = vsel %vm22_vm3, %v193_v9, %v192_v8  ;;  %v209_v14 = vld [vmem:[%s462_s0 + $0x13] sm:$0x1]   ;;  %v207_v15 = vld [vmem:[%s462_s0 + $0xe] sm:$0x1]   ;;  %s267_s7 = smov 91   ;;  %s268_s8 = smov 94  }
   0x6   :  { %v211_v16 = vld [vmem:[%s462_s0 + $0x3] sm:$0x1]   ;;  %s269_s11 = smov 75   ;;  %v214_v17 = vld [vmem:[%s462_s0 + $0xd] sm:$0x1]   ;;  %s270_s16 = smov 69  }
   0x7   :  { %v212_v18 = vld [vmem:[%s462_s0 + $0x8] sm:$0x1]   ;;  %s271_s17 = smov 72   ;;  %v216_v19 = vld [vmem:[%s462_s0 + $0x12] sm:$0x1]   ;;  %s272_s20 = smov 66  }
   0x8   :  { %v220_v20 = vld [vmem:[%s462_s0 + $0x2] sm:$0x1]   ;;  %v218_v21 = vld [vmem:[%s462_s0 + $0x17] sm:$0x1]   ;;  %s273_s25 = smov 50   ;;  %s274_s26 = smov 63  }
   0x9   :  { %v221_v22 = vld [vmem:[%s462_s0 + $0x7] sm:$0x1]   ;;  %s275_s29 = smov 47   ;;  %v225_v23 = vld [vmem:[%s462_s0 + $0x11] sm:$0x1]   ;;  %s276_s5 = smov 41  }
   0xa   :  { %v223_v24 = vld [vmem:[%s462_s0 + $0xc] sm:$0x1]   ;;  %s277_s6 = smov 44   ;;  %v227_v25 = vld [vmem:[%s462_s0 + $0x16] sm:$0x1]   ;;  %s278_s9 = smov 38  }
   0xb   :  { %v230_v26 = vld [vmem:[%s462_s0 + $0x6] sm:$0x1]   ;;  %v229_v27 = vld [vmem:[%s462_s0 + $0x1] sm:$0x1]   ;;  %s279_s14 = smov 22   ;;  %s280_s15 = smov 25  }
   0xc   :  { %52 = vrot.lane.b32.xlu1 %v51_v11, %s264_s27  ;;  %24 = vrot.lane.b32.xlu0 %v23_v12, %s265_s28  ;;  %v232_v28 = vld [vmem:[%s462_s0 + $0xb] sm:$0x1]   ;;  %s281_s18 = smov 19   ;;  %v236_v29 = vld [vmem:[%s462_s0 + $0x15] sm:$0x1]   ;;  %s282_s23 = smov 13  }
   0xd   :  { %68 = vrot.lane.b32.xlu2 %v205_v13, %s266_s2  ;;  %v234_v30 = vld [vmem:[%s462_s0 + $0x10] sm:$0x1]   ;;  %s283_s24 = smov 16   ;;  %vm3_vm4 = vcmask 203776   ;;  %v2_v31 = vld [vmem:[%s462_s0] sm:$0x1]  }
   0xe   :  { %4 = vst.msk [vmem:[%s463_s1] sm:$0x1] %vm3_vm4, %v2_v31   ;;  %vm40_vm5 = vcmask 130048   ;;  %vm13_vm6 = vcmask 179200   ;;  %vm16_vm7 = vcmask 1048552   ;;  %vm64_vm8 = vcmask 1023776  }
   0xf   :  { %vm91_vm9 = vcmask 818776   ;;  %vm54_vm10 = vcmask 105472   ;;  %vm57_vm11 = vcmask 1048480   ;;  %vm26_vm12 = vcmask 154624  }
  0x10   :  { %vm29_vm13 = vcmask 1048528   ;;  %vm43_vm14 = vcmask 1048504   ;;  %vm70_vm15 = vcmask 999176   ;;  %vm84_vm0 = vcmask 949976  }
  0x11   :  { %vm77_vm1 = vcmask 974576   ;;  %vm111_vm2 = vcmask 744976   ;;  %vm104_vm3 = vcmask 769576   ;;  %vm97_vm4 = vcmask 794176  }
  0x14   :  { %82 = vrot.lane.b32.xlu1 %v209_v14, %s267_s7  ;;  %75 = vrot.lane.b32.xlu0 %v207_v15, %s268_s8 }
  0x15   :  { %89 = vrot.lane.b32.xlu2 %v211_v16, %s269_s11 }
  0x1c   :  { %102 = vrot.lane.b32.xlu1 %v214_v17, %s270_s16  ;;  %95 = vrot.lane.b32.xlu0 %v212_v18, %s271_s17 }
  0x1d   :  { %109 = vrot.lane.b32.xlu2 %v216_v19, %s272_s20 }
  0x24   :  { %123 = vrot.lane.b32.xlu1 %v220_v20, %s273_s25  ;;  %116 = vrot.lane.b32.xlu0 %v218_v21, %s274_s26 }
  0x25   :  { %129 = vrot.lane.b32.xlu2 %v221_v22, %s275_s29 }
  0x2c   :  { %143 = vrot.lane.b32.xlu1 %v225_v23, %s276_s5  ;;  %136 = vrot.lane.b32.xlu0 %v223_v24, %s277_s6 }
  0x2d   :  { %150 = vrot.lane.b32.xlu2 %v227_v25, %s278_s9 }
  0x34   :  { %163 = vrot.lane.b32.xlu1 %v230_v26, %s279_s14  ;;  %157 = vrot.lane.b32.xlu0 %v229_v27, %s280_s15 }
  0x35   :  { %170 = vrot.lane.b32.xlu2 %v232_v28, %s281_s18 }
  0x3c   :  { %184 = vrot.lane.b32.xlu1 %v236_v29, %s282_s23  ;;  %177 = vrot.lane.b32.xlu0 %v234_v30, %s283_s24 }
  0x5f   :  { %v63_v32 = vpop.permute.xlu2 %62  }
  0x67   :  { %v69_v33 = vpop.permute.xlu2 %68  }
  0x6f   :  { %v90_v34 = vpop.permute.xlu2 %89  }
  0x76   :  { %v39_v35 = vpop.permute.xlu1 %38   ;;  %v12_v36 = vpop.permute.xlu0 %11  }
  0x77   :  { %198 = vst.msk [vmem:[%s463_s1 + $0x3] sm:$0x1] %vm40_vm5, %v39_v35   ;;  %v110_v37 = vpop.permute.xlu2 %109   ;;  %vm131_vm5 = vcmask 589176  }
  0x78   :  { %191 = vst.msk [vmem:[%s463_s1 + $0x1] sm:$0x1] %vm13_vm6, %v12_v36   ;;  %vm125_vm6 = vcmask 613776  }
  0x79   :  { %17 = vst.msk [vmem:[%s463_s1] sm:$0x1] %vm16_vm7, %v12_v36   ;;  %vm118_vm7 = vcmask 720376  }
  0x7a   :  { %65 = vst.msk [vmem:[%s463_s1] sm:$0x1] %vm64_vm8, %v63_v32   ;;  %vm152_vm8 = vcmask 515376  }
  0x7b   :  { %92 = vst.msk [vmem:[%s463_s1] sm:$0x1] %vm91_vm9, %v90_v34   ;;  %vm145_vm9 = vcmask 539976  }
  0x7e   :  { %v53_v38 = vpop.permute.xlu1 %52   ;;  %v25_v39 = vpop.permute.xlu0 %24  }
  0x7f   :  { %202 = vst.msk [vmem:[%s463_s1 + $0x4] sm:$0x1] %vm54_vm10, %v53_v38   ;;  %v130_v40 = vpop.permute.xlu2 %129   ;;  %vm138_vm10 = vcmask 564576  }
  0x80   :  { %203 = vst.msk [vmem:[%s463_s1 + $0x3] sm:$0x1] %vm57_vm11, %v53_v38   ;;  %vm172_vm11 = vcmask 359576  }
  0x81   :  { %194 = vst.msk [vmem:[%s463_s1 + $0x2] sm:$0x1] %vm26_vm12, %v25_v39   ;;  %vm165_vm12 = vcmask 384176  }
  0x82   :  { %195 = vst.msk [vmem:[%s463_s1 + $0x1] sm:$0x1] %vm29_vm13, %v25_v39   ;;  %vm159_vm13 = vcmask 408776  }
  0x83   :  { %199 = vst.msk [vmem:[%s463_s1 + $0x2] sm:$0x1] %vm43_vm14, %v39_v35   ;;  %vm186_vm14 = vcmask 310376  }
  0x84   :  { %206 = vst.msk [vmem:[%s463_s1 + $0x1] sm:$0x1] %vm70_vm15, %v69_v33   ;;  %vm179_vm15 = vcmask 334976  }
  0x86   :  { %v83_v41 = vpop.permute.xlu1 %82   ;;  %v76_v42 = vpop.permute.xlu0 %75  }
  0x87   :  { %210 = vst.msk [vmem:[%s463_s1 + $0x3] sm:$0x1] %vm84_vm0, %v83_v41   ;;  %v151_v43 = vpop.permute.xlu2 %150  }
  0x88   :  { %208 = vst.msk [vmem:[%s463_s1 + $0x2] sm:$0x1] %vm77_vm1, %v76_v42  }
  0x89   :  { %217 = vst.msk [vmem:[%s463_s1 + $0x3] sm:$0x1] %vm111_vm2, %v110_v37  }
  0x8e   :  { %v103_v44 = vpop.permute.xlu1 %102   ;;  %v96_v45 = vpop.permute.xlu0 %95  }
  0x8f   :  { %215 = vst.msk [vmem:[%s463_s1 + $0x2] sm:$0x1] %vm104_vm3, %v103_v44   ;;  %v171_v46 = vpop.permute.xlu2 %170  }
  0x90   :  { %213 = vst.msk [vmem:[%s463_s1 + $0x1] sm:$0x1] %vm97_vm4, %v96_v45  }
  0x91   :  { %222 = vst.msk [vmem:[%s463_s1 + $0x1] sm:$0x1] %vm131_vm5, %v130_v40  }
  0x96   :  { %v124_v47 = vpop.permute.xlu1 %123   ;;  %v117_v48 = vpop.permute.xlu0 %116  }
  0x97   :  { %126 = vst.msk [vmem:[%s463_s1] sm:$0x1] %vm125_vm6, %v124_v47  }
  0x98   :  { %219 = vst.msk [vmem:[%s463_s1 + $0x4] sm:$0x1] %vm118_vm7, %v117_v48  }
  0x99   :  { %228 = vst.msk [vmem:[%s463_s1 + $0x4] sm:$0x1] %vm152_vm8, %v151_v43  }
  0x9e   :  { %v144_v49 = vpop.permute.xlu1 %143   ;;  %v137_v50 = vpop.permute.xlu0 %136  }
  0x9f   :  { %226 = vst.msk [vmem:[%s463_s1 + $0x3] sm:$0x1] %vm145_vm9, %v144_v49  }
  0xa0   :  { %224 = vst.msk [vmem:[%s463_s1 + $0x2] sm:$0x1] %vm138_vm10, %v137_v50  }
  0xa1   :  { %233 = vst.msk [vmem:[%s463_s1 + $0x2] sm:$0x1] %vm172_vm11, %v171_v46  }
  0xa6   :  { %v164_v51 = vpop.permute.xlu1 %163   ;;  %v158_v52 = vpop.permute.xlu0 %157  }
  0xa7   :  { %231 = vst.msk [vmem:[%s463_s1 + $0x1] sm:$0x1] %vm165_vm12, %v164_v51  }
  0xa8   :  { %160 = vst.msk [vmem:[%s463_s1] sm:$0x1] %vm159_vm13, %v158_v52  }
  0xae   :  { %v185_v53 = vpop.permute.xlu1 %184   ;;  %v178_v54 = vpop.permute.xlu0 %177  }
  0xaf   :  { %237 = vst.msk [vmem:[%s463_s1 + $0x4] sm:$0x1] %vm186_vm14, %v185_v53  }
  0xb0   :  { %235 = vst.msk [vmem:[%s463_s1 + $0x3] sm:$0x1] %vm179_vm15, %v178_v54  }

// kernel: simple_conv_agent_forward.1
= control target key start
LH: loop header
LB: loop body
LE: loop exit
PB: predicated region body
PF: predicated region fallthrough
CT: control target
= control target key end

     0   :  { %vm355_vm0 = vcmask 1043456   ;;  %vm351_vm1 = vcmask 719872   ;;  %vm537_vm2 = vcmask 261120   ;;  %s2807_s1 = inlined_call_operand.vmem [shape: bf16[600,32], index: 1, kind: input, shape index: {}]   ;;  %s2808_s2 = inlined_call_operand.vmem [shape: f32[1,32], index: 2, kind: input, shape index: {}]   ;;  %s2809_s0 = inlined_call_operand.vmem [shape: bf16[9,8,600], index: 0, kind: input, shape index: {}]   ;;  %s2810_s3 = inlined_call_operand.vmem [shape: bf16[288,32], index: 3, kind: input, shape index: {}]   ;;  %s2811_s4 = inlined_call_operand.vmem [shape: f32[1,32], index: 4, kind: input, shape index: {}]   ;;  %s2812_s6 = inlined_call_operand.vmem [shape: f32[1,32], index: 6, kind: input, shape index: {}]   ;;  %s2813_s5 = inlined_call_operand.vmem [shape: bf16[32,32], index: 5, kind: input, shape index: {}]   ;;  %s2814_s7 = inlined_call_operand.vmem [shape: f32[8,32], index: 7, kind: output, shape index: {}]  }
   0x1   :  { %v1908_v0 = vld [vmem:[%s2807_s1 + $0x38] sm:$0xff]  ;;  %v1930_v4 = vld [vmem:[%s2807_s1 + $0x30] sm:$0xff]  ;;  %v1954_v8 = vld [vmem:[%s2807_s1 + $0x28] sm:$0xff] }
   0x2   :  { %v1913_v1 = vld [vmem:[%s2807_s1 + $0x78] sm:$0xff]  ;;  %359 = vmatpush.bf16.msra.mxu0 %v1908_v0  ;;  %v1935_v5 = vld [vmem:[%s2807_s1 + $0x70] sm:$0xff]  ;;  %v1959_v9 = vld [vmem:[%s2807_s1 + $0x68] sm:$0xff] }
   0x3   :  { %v1918_v2 = vld [vmem:[%s2807_s1 + $0xb8] sm:$0xff]  ;;  %372 = vmatpush.bf16.msra.mxu1 %v1913_v1  ;;  %v1942_v6 = vld [vmem:[%s2807_s1 + $0xb0] sm:$0xff]  ;;  %v1966_v10 = vld [vmem:[%s2807_s1 + $0xa8] sm:$0xff] }
   0x4   :  { %v1923_v3 = vld [vmem:[%s2807_s1 + $0xf8] sm:$0xff]  ;;  %385 = vmatpush.bf16.msra.mxu2 %v1918_v2  ;;  %v1947_v7 = vld [vmem:[%s2807_s1 + $0xf0] sm:$0xff]  ;;  %v1971_v11 = vld [vmem:[%s2807_s1 + $0xe8] sm:$0xff] }
   0x5   :  { %398 = vmatpush.bf16.msra.mxu3 %v1923_v3  ;;  %v1978_v12 = vld [vmem:[%s2807_s1 + $0x20] sm:$0xff]  ;;  %v2002_v16 = vld [vmem:[%s2807_s1 + $0x18] sm:$0xff]  ;;  %v101_v20 = vld [vmem:[%s2807_s1 + $0x128] sm:$0xf] }
   0x6   :  { %360 = vmatpush.bf16.msra.mxu0 %v1930_v4  ;;  %v1983_v13 = vld [vmem:[%s2807_s1 + $0x60] sm:$0xff]  ;;  %v2007_v17 = vld [vmem:[%s2807_s1 + $0x58] sm:$0xff]  ;;  %v2029_v21 = vld [vmem:[%s2807_s1 + $0x10] sm:$0xff]  ;;  %v275_v25 = vunpack.c.l.b16 %v101_v20 }
   0x7   :  { %373 = vmatpush.bf16.msra.mxu1 %v1935_v5  ;;  %v1990_v14 = vld [vmem:[%s2807_s1 + $0xa0] sm:$0xff]  ;;  %v2014_v18 = vld [vmem:[%s2807_s1 + $0x98] sm:$0xff]  ;;  %v2034_v22 = vld [vmem:[%s2807_s1 + $0x50] sm:$0xff] }
   0x8   :  { %386 = vmatpush.bf16.msra.mxu2 %v1942_v6  ;;  %v1995_v15 = vld [vmem:[%s2807_s1 + $0xe0] sm:$0xff]  ;;  %v2019_v19 = vld [vmem:[%s2807_s1 + $0xd8] sm:$0xff]  ;;  %v2041_v23 = vld [vmem:[%s2807_s1 + $0x90] sm:$0xff]  ;;  %v313_v31 = vpack.c.b16 %v275_v25, %v275_v25 }
   0x9   :  { %399 = vmatpush.bf16.msra.mxu3 %v1947_v7  ;;  %v2046_v24 = vld [vmem:[%s2807_s1 + $0xd0] sm:$0xff]  ;;  %v2053_v26 = vld [vmem:[%s2807_s1 + $0x8] sm:$0xff]  ;;  %v106_v30 = vld [vmem:[%s2809_s0] sm:$0xff] }
   0xa   :  { %361 = vmatpush.bf16.msra.mxu0 %v1954_v8  ;;  %v2058_v27 = vld [vmem:[%s2807_s1 + $0x48] sm:$0xff]  ;;  %v2083_v33 = vld [vmem:[%s2807_s1] sm:$0xff]  ;;  %v112_v35 = vunpack.c.l.b16 %v106_v30  ;;  %v113_v36 = vunpack.c.h.b16 %v106_v30  ;;  %v2092_v37 = vsel %vm355_vm0, %v313_v31, 0  ;;  %v2122_v47 = vld [vmem:[%s2807_s1 + $0x118] sm:$0xff] }
   0xb   :  { %374 = vmatpush.bf16.msra.mxu1 %v1959_v9  ;;  %v2065_v28 = vld [vmem:[%s2807_s1 + $0x88] sm:$0xff]  ;;  %v2088_v34 = vld [vmem:[%s2807_s1 + $0x40] sm:$0xff]  ;;  %v2131_v48 = vld [vmem:[%s2807_s1 + $0x110] sm:$0xff] }
   0xc   :  { %387 = vmatpush.bf16.msra.mxu2 %v1966_v10  ;;  %v2070_v29 = vld [vmem:[%s2807_s1 + $0xc8] sm:$0xff]  ;;  %v2097_v38 = vld [vmem:[%s2807_s1 + $0x80] sm:$0xff]  ;;  %v117_v42 = vpack.c.b16 %v112_v35, %v112_v35  ;;  %v118_v43 = vpack.c.b16 %v113_v36, %v113_v36  ;;  %v108_v50 = vld [vmem:[%s2809_s0 + $0x10] sm:$0xf] }
   0xd   :  { %400 = vmatpush.bf16.msra.mxu3 %v1971_v11  ;;  %v107_v32 = vld [vmem:[%s2809_s0 + $0x8] sm:$0xff]  ;;  %v2102_v39 = vld [vmem:[%s2807_s1 + $0xc0] sm:$0xff]  ;;  %v116_v51 = vunpack.c.l.b16 %v108_v50  ;;  %v1645_v54 = vld [vmem:[%s2809_s0 + $0x14] sm:$0xff] }
   0xe   :  { %362 = vmatpush.bf16.msra.mxu0 %v1978_v12  ;;  %v114_v40 = vunpack.c.l.b16 %v107_v32  ;;  %v115_v41 = vunpack.c.h.b16 %v107_v32  ;;  %v2111_v44 = vld [vmem:[%s2807_s1 + $0x120] sm:$0xff]  ;;  %v2140_v49 = vld [vmem:[%s2807_s1 + $0x108] sm:$0xff]  ;;  %v437_v55 = vunpack.c.l.b16 %v1645_v54  ;;  %v438_v57 = vunpack.c.h.b16 %v1645_v54  ;;  %v2235_v31 = vld [vmem:[%s2809_s0 + $0x30] sm:$0xff] }
   0xf   :  { %375 = vmatpush.bf16.msra.mxu1 %v1983_v13  ;;  %v2152_v52 = vld [vmem:[%s2807_s1 + $0x100] sm:$0xff]  ;;  %v121_v53 = vpack.c.b16 %v116_v51, %v116_v51  ;;  %v564_v32 = vunpack.c.h.b16 %v2235_v31  ;;  %v1807_v36 = vld [vmem:[%s2810_s3 + $0x18] sm:$0xff] }
  0x10   :  { %388 = vmatpush.bf16.msra.mxu2 %v1990_v14  ;;  %v119_v45 = vpack.c.b16 %v114_v40, %v114_v40  ;;  %v120_v46 = vpack.c.b16 %v115_v41, %v115_v41  ;;  %v1646_v56 = vld [vmem:[%s2809_s0 + $0x1c] sm:$0xff]  ;;  %v442_v59 = vpack.c.b16 %v437_v55, %v437_v55  ;;  %v443_v60 = vpack.c.b16 %v438_v57, %v438_v57  ;;  %v1647_v62 = vld [vmem:[%s2809_s0 + $0x24] sm:$0xf]  ;;  %v1806_v40 = vld [vmem:[%s2810_s3 + $0x10] sm:$0xff] }
  0x11   :  { %401 = vmatpush.bf16.msra.mxu3 %v1995_v15  ;;  %v439_v58 = vunpack.c.l.b16 %v1646_v56  ;;  %v440_v63 = vunpack.c.h.b16 %v1646_v56  ;;  %v441_v20 = vunpack.c.l.b16 %v1647_v62  ;;  %v569_v35 = vpack.c.b16 %v564_v32, %v564_v32  ;;  %v2257_v41 = vld [vmem:[%s2808_s2] ss:$0 sm:$0xff]  ;;  %v2268_v50 = vld [vmem:[%s2809_s0 + $0x44] sm:$0xff] }
  0x12   :  { %363 = vmatpush.bf16.msra.mxu0 %v2002_v16  ;;  %v658_v51 = vunpack.c.l.b16 %v2268_v50 }
  0x13   :  { %376 = vmatpush.bf16.msra.mxu1 %v2007_v17  ;;  %v444_v61 = vpack.c.b16 %v439_v58, %v439_v58  ;;  %v445_v25 = vpack.c.b16 %v440_v63, %v440_v63  ;;  %v446_v30 = vpack.c.b16 %v441_v20, %v441_v20  ;;  %v2287_v20 = vld [vmem:[%s2809_s0 + $0x50] sm:$0xff] }
  0x14   :  { %389 = vmatpush.bf16.msra.mxu2 %v2014_v18  ;;  %v663_v55 = vpack.c.b16 %v658_v51, %v658_v51  ;;  %v779_v32 = vunpack.c.l.b16 %v2287_v20 }
  0x15   :  { %402 = vmatpush.bf16.msra.mxu3 %v2019_v19 }
  0x16   :  { %364 = vmatpush.bf16.msra.mxu0 %v2029_v21 }
  0x17   :  { %377 = vmatpush.bf16.msra.mxu1 %v2034_v22 }
  0x18   :  { %390 = vmatpush.bf16.msra.mxu2 %v2041_v23 }
  0x19   :  { %403 = vmatpush.bf16.msra.mxu3 %v2046_v24 }
  0x1a   :  { %365 = vmatpush.bf16.msra.mxu0 %v2053_v26 }
  0x1b   :  { %378 = vmatpush.bf16.msra.mxu1 %v2058_v27 }
  0x1c   :  { %391 = vmatpush.bf16.msra.mxu2 %v2065_v28 }
  0x1d   :  { %404 = vmatpush.bf16.msra.mxu3 %v2070_v29 }
  0x1e   :  { %366 = vmatpush.bf16.msra.mxu0 %v2083_v33 }
  0x1f   :  { %379 = vmatpush.bf16.msra.mxu1 %v2088_v34 }
  0x20   :  { %392 = vmatpush.bf16.msra.mxu2 %v2097_v38 }
  0x21   :  { %405 = vmatpush.bf16.msra.mxu3 %v2102_v39  ;;  %367 = vmatmul.bf16.vlgmr.msra.gmra.mxu0 %v117_v42 }
  0x22   :  { %413 = vmatpush.bf16.msrb.mxu0 %v2092_v37  ;;  %380 = vmatmul.bf16.vlgmr.msra.gmra.mxu1 %v118_v43 }
  0x23   :  { %454 = vmatpush.bf16.msrb.mxu1 %v1908_v0  ;;  %393 = vmatmul.bf16.vlgmr.msra.gmra.mxu2 %v119_v45 }
  0x24   :  { %467 = vmatpush.bf16.msrb.mxu2 %v1913_v1  ;;  %406 = vmatmul.bf16.vlgmr.msra.gmra.mxu3 %v120_v46 }
  0x25   :  { %480 = vmatpush.bf16.msrb.mxu3 %v1918_v2 }
  0x26   :  { %414 = vmatpush.bf16.msrb.mxu0 %v2111_v44 }
  0x27   :  { %455 = vmatpush.bf16.msrb.mxu1 %v1930_v4 }
  0x28   :  { %468 = vmatpush.bf16.msrb.mxu2 %v1935_v5 }
  0x29   :  { %481 = vmatpush.bf16.msrb.mxu3 %v1942_v6 }
  0x2a   :  { %415 = vmatpush.bf16.msrb.mxu0 %v2122_v47 }
  0x2b   :  { %456 = vmatpush.bf16.msrb.mxu1 %v1954_v8 }
  0x2c   :  { %469 = vmatpush.bf16.msrb.mxu2 %v1959_v9 }
  0x2d   :  { %482 = vmatpush.bf16.msrb.mxu3 %v1966_v10 }
  0x2e   :  { %416 = vmatpush.bf16.msrb.mxu0 %v2131_v48 }
  0x2f   :  { %457 = vmatpush.bf16.msrb.mxu1 %v1978_v12 }
  0x30   :  { %470 = vmatpush.bf16.msrb.mxu2 %v1983_v13 }
  0x31   :  { %483 = vmatpush.bf16.msrb.mxu3 %v1990_v14 }
  0x32   :  { %417 = vmatpush.bf16.msrb.mxu0 %v2140_v49 }
  0x33   :  { %458 = vmatpush.bf16.msrb.mxu1 %v2002_v16 }
  0x34   :  { %471 = vmatpush.bf16.msrb.mxu2 %v2007_v17 }
  0x35   :  { %484 = vmatpush.bf16.msrb.mxu3 %v2014_v18 }
  0x36   :  { %418 = vmatpush.bf16.msrb.mxu0 %v2152_v52 }
  0x37   :  { %459 = vmatpush.bf16.msrb.mxu1 %v2029_v21 }
  0x38   :  { %472 = vmatpush.bf16.msrb.mxu2 %v2034_v22 }
  0x39   :  { %485 = vmatpush.bf16.msrb.mxu3 %v2041_v23  ;;  %1644 = vmatmul.msk.bf16.vlgmr.msrb.gmra.mxu0 %vm351_vm1, %v121_v53 }
  0x3a   :  { %493 = vmatpush.bf16.msra.mxu0 %v1923_v3 }
  0x3b   :  { %460 = vmatpush.bf16.msrb.mxu1 %v2053_v26 }
  0x3c   :  { %473 = vmatpush.bf16.msrb.mxu2 %v2058_v27 }
  0x3d   :  { %486 = vmatpush.bf16.msrb.mxu3 %v2065_v28 }
  0x3e   :  { %494 = vmatpush.bf16.msra.mxu0 %v1947_v7 }
  0x3f   :  { %461 = vmatpush.bf16.msrb.mxu1 %v2083_v33 }
  0x40   :  { %474 = vmatpush.bf16.msrb.mxu2 %v2088_v34 }
  0x41   :  { %487 = vmatpush.bf16.msrb.mxu3 %v2097_v38 }
  0x42   :  { %495 = vmatpush.bf16.msra.mxu0 %v1971_v11  ;;  %462 = vmatmul.bf16.vlgmr.msrb.gmra.mxu1 %v442_v59 }
  0x43   :  { %508 = vmatpush.bf16.msra.mxu1 %v2092_v37  ;;  %475 = vmatmul.bf16.vlgmr.msrb.gmra.mxu2 %v443_v60 }
  0x44   :  { %488 = vmatmul.bf16.vlgmr.msrb.gmra.mxu3 %v444_v61  ;;  %547 = vmatpush.bf16.msra.mxu2 %v1807_v36 }
  0x45   :  { %578 = vmatpush.bf16.msra.mxu3 %v1908_v0 }
  0x46   :  { %496 = vmatpush.bf16.msra.mxu0 %v1995_v15 }
  0x47   :  { %509 = vmatpush.bf16.msra.mxu1 %v2111_v44 }
  0x48   :  { %548 = vmatpush.bf16.msra.mxu2 %v1806_v40  ;;  %v784_v40 = vpack.c.b16 %v779_v32, %v779_v32 }
  0x49   :  { %579 = vmatpush.bf16.msra.mxu3 %v1930_v4 }
  0x4a   :  { %497 = vmatpush.bf16.msra.mxu0 %v2019_v19 }
  0x4b   :  { %510 = vmatpush.bf16.msra.mxu1 %v2122_v47 }
  0x4c   :  { %591 = vmatpush.bf16.msrb.mxu2 %v1913_v1 }
  0x4d   :  { %580 = vmatpush.bf16.msra.mxu3 %v1954_v8 }
  0x4e   :  { %498 = vmatpush.bf16.msra.mxu0 %v2046_v24 }
  0x4f   :  { %511 = vmatpush.bf16.msra.mxu1 %v2131_v48 }
  0x50   :  { %592 = vmatpush.bf16.msrb.mxu2 %v1935_v5 }
  0x51   :  { %581 = vmatpush.bf16.msra.mxu3 %v1978_v12 }
  0x52   :  { %499 = vmatpush.bf16.msra.mxu0 %v2070_v29 }
  0x53   :  { %512 = vmatpush.bf16.msra.mxu1 %v2140_v49 }
  0x54   :  { %593 = vmatpush.bf16.msrb.mxu2 %v1959_v9 }
  0x55   :  { %582 = vmatpush.bf16.msra.mxu3 %v2002_v16 }
  0x56   :  { %500 = vmatpush.bf16.msra.mxu0 %v2102_v39 }
  0x57   :  { %513 = vmatpush.bf16.msra.mxu1 %v2152_v52 }
  0x58   :  { %594 = vmatpush.bf16.msrb.mxu2 %v1983_v13 }
  0x59   :  { %583 = vmatpush.bf16.msra.mxu3 %v2029_v21  ;;  %501 = vmatmul.bf16.vlgmr.msra.gmra.mxu0 %v445_v25 }
  0x5a   :  { %604 = vmatpush.bf16.msrb.mxu0 %v1918_v2  ;;  %1648 = vmatmul.msk.bf16.vlgmr.msra.gmra.mxu1 %vm351_vm1, %v446_v30 }
  0x5b   :  { %617 = vmatpush.bf16.msrb.mxu1 %v1923_v3 }
  0x5c   :  { %595 = vmatpush.bf16.msrb.mxu2 %v2007_v17 }
  0x5d   :  { %584 = vmatpush.bf16.msra.mxu3 %v2053_v26 }
  0x5e   :  { %605 = vmatpush.bf16.msrb.mxu0 %v1942_v6 }
  0x5f   :  { %618 = vmatpush.bf16.msrb.mxu1 %v1947_v7 }
  0x60   :  { %596 = vmatpush.bf16.msrb.mxu2 %v2034_v22 }
  0x61   :  { %585 = vmatpush.bf16.msra.mxu3 %v2083_v33 }
  0x62   :  { %606 = vmatpush.bf16.msrb.mxu0 %v1966_v10 }
  0x63   :  { %619 = vmatpush.bf16.msrb.mxu1 %v1971_v11 }
  0x64   :  { %597 = vmatpush.bf16.msrb.mxu2 %v2058_v27 }
  0x65   :  { %632 = vmatpush.bf16.msrb.mxu3 %v2092_v37 }
  0x66   :  { %607 = vmatpush.bf16.msrb.mxu0 %v1990_v14 }
  0x67   :  { %620 = vmatpush.bf16.msrb.mxu1 %v1995_v15 }
  0x68   :  { %598 = vmatpush.bf16.msrb.mxu2 %v2088_v34 }
  0x69   :  { %633 = vmatpush.bf16.msrb.mxu3 %v2111_v44 }
  0x6a   :  { %608 = vmatpush.bf16.msrb.mxu0 %v2014_v18 }
  0x6b   :  { %621 = vmatpush.bf16.msrb.mxu1 %v2019_v19 }
  0x6d   :  { %634 = vmatpush.bf16.msrb.mxu3 %v2122_v47 }
  0x6e   :  { %609 = vmatpush.bf16.msrb.mxu0 %v2041_v23 }
  0x6f   :  { %622 = vmatpush.bf16.msrb.mxu1 %v2046_v24 }
  0x71   :  { %635 = vmatpush.bf16.msrb.mxu3 %v2131_v48 }
  0x72   :  { %610 = vmatpush.bf16.msrb.mxu0 %v2065_v28 }
  0x73   :  { %623 = vmatpush.bf16.msrb.mxu1 %v2070_v29 }
  0x75   :  { %636 = vmatpush.bf16.msrb.mxu3 %v2140_v49 }
  0x76   :  { %611 = vmatpush.bf16.msrb.mxu0 %v2097_v38 }
  0x77   :  { %624 = vmatpush.bf16.msrb.mxu1 %v2102_v39 }
  0x79   :  { %637 = vmatpush.bf16.msrb.mxu3 %v2152_v52 }
  0x7a   :  { %686 = vmatpush.bf16.msra.mxu0 %v1913_v1  ;;  %625 = vmatmul.bf16.vlgmr.msrb.gmra.mxu1 %v569_v35  ;;  %v2293_v35 = vld [vmem:[%s2809_s0 + $0x28] sm:$0xff] }
  0x7b   :  { %699 = vmatpush.bf16.msra.mxu1 %v1918_v2  ;;  %v561_v36 = vunpack.c.l.b16 %v2293_v35 }
  0x7e   :  { %687 = vmatpush.bf16.msra.mxu0 %v1935_v5 }
  0x7f   :  { %700 = vmatpush.bf16.msra.mxu1 %v1942_v6 }
  0x82   :  { %688 = vmatpush.bf16.msra.mxu0 %v1959_v9 }
  0x83   :  { %701 = vmatpush.bf16.msra.mxu1 %v1966_v10 }
  0x86   :  { %689 = vmatpush.bf16.msra.mxu0 %v1983_v13 }
  0x87   :  { %702 = vmatpush.bf16.msra.mxu1 %v1990_v14 }
  0x8a   :  { %690 = vmatpush.bf16.msra.mxu0 %v2007_v17 }
  0x8b   :  { %703 = vmatpush.bf16.msra.mxu1 %v2014_v18 }
  0x8e   :  { %691 = vmatpush.bf16.msra.mxu0 %v2034_v22 }
  0x8f   :  { %704 = vmatpush.bf16.msra.mxu1 %v2041_v23 }
  0x92   :  { %692 = vmatpush.bf16.msra.mxu0 %v2058_v27 }
  0x93   :  { %705 = vmatpush.bf16.msra.mxu1 %v2065_v28 }
  0x96   :  { %693 = vmatpush.bf16.msra.mxu0 %v2088_v34 }
  0x97   :  { %706 = vmatpush.bf16.msra.mxu1 %v2097_v38 }
  0x9a   :  { %707 = vmatmul.bf16.vlgmr.msra.gmra.mxu1 %v663_v55 }
  0x9b   :  { %796 = vmatpush.bf16.msrb.mxu1 %v1908_v0 }
  0x9e   :  { %v368_v42 = vpop.f32.mrf.mxu0 }
  0x9f   :  { %797 = vmatpush.bf16.msrb.mxu1 %v1930_v4  ;;  %v381_v43 = vpop.f32.mrf.mxu1  ;;  %v369_v45 = vadd.f32 %v2257_v41, %v368_v42  ;;  %v566_v42 = vpack.c.b16 %v561_v36, %v561_v36 }
  0xa1   :  { %v382_v46 = vadd.f32 %v381_v43, %v369_v45  ;;  %586 = vmatmul.bf16.vlgmr.msra.gmra.mxu3 %v566_v42 }
  0xa2   :  { %712 = vmatpush.bf16.msra.mxu3 %v1923_v3 }
  0xa3   :  { %798 = vmatpush.bf16.msrb.mxu1 %v1954_v8 }
  0xa6   :  { %v370_v53 = vpop.f32.mrf.mxu0  ;;  %v394_v56 = vpop.f32.mrf.mxu2  ;;  %713 = vmatpush.bf16.msra.mxu3 %v1947_v7 }
  0xa7   :  { %799 = vmatpush.bf16.msrb.mxu1 %v1978_v12  ;;  %v383_v54 = vpop.f32.mrf.mxu1  ;;  %v407_v57 = vpop.f32.mrf.mxu3  ;;  %v395_v58 = vadd.f32 %v394_v56, %v382_v46 }
  0xa8   :  { %v1660_v54 = vld [vmem:[%s2809_s0 + $0x38] sm:$0xf] }
  0xa9   :  { %v408_v59 = vadd.f32 %v407_v57, %v395_v58  ;;  %v565_v57 = vunpack.c.l.b16 %v1660_v54  ;;  %v1662_v54 = vld [vmem:[%s2809_s0 + $0x3c] sm:$0xff] }
  0xaa   :  { %714 = vmatpush.bf16.msra.mxu3 %v1971_v11 }
  0xab   :  { %800 = vmatpush.bf16.msrb.mxu1 %v2002_v16  ;;  %v570_v58 = vpack.c.b16 %v565_v57, %v565_v57 }
  0xae   :  { %v396_v60 = vpop.f32.mrf.mxu2  ;;  %715 = vmatpush.bf16.msra.mxu3 %v1995_v15 }
  0xaf   :  { %801 = vmatpush.bf16.msrb.mxu1 %v2029_v21  ;;  %v409_v61 = vpop.f32.mrf.mxu3 }
  0xb1   :  { %1661 = vmatmul.msk.bf16.vlgmr.msrb.gmra.mxu3 %vm351_vm1, %v570_v58 }
  0xb2   :  { %716 = vmatpush.bf16.msra.mxu3 %v2019_v19 }
  0xb3   :  { %802 = vmatpush.bf16.msrb.mxu1 %v2053_v26 }
  0xb6   :  { %v420_v62 = vpop.f32.mrf.mxu0  ;;  %717 = vmatpush.bf16.msra.mxu3 %v2046_v24 }
  0xb7   :  { %803 = vmatpush.bf16.msrb.mxu1 %v2083_v33  ;;  %v2278_v63 = vadd.f32 %v420_v62, %v408_v59  ;;  %v563_v59 = vunpack.c.l.b16 %v2235_v31 }
  0xba   :  { %804 = vmatmul.bf16.vlgmr.msrb.gmra.mxu1 %v784_v40  ;;  %v1677_v40 = vld [vmem:[%s2809_s0 + $0x60] sm:$0xf]  ;;  %718 = vmatpush.bf16.msra.mxu3 %v2070_v29 }
  0xbb   :  { %850 = vmatpush.bf16.msra.mxu1 %v2092_v37 }
  0xbe   :  { %v422_v30 = vpop.f32.mrf.mxu0  ;;  %719 = vmatpush.bf16.msra.mxu3 %v2102_v39 }
  0xbf   :  { %851 = vmatpush.bf16.msra.mxu1 %v2111_v44  ;;  %v463_v25 = vpop.f32.mrf.mxu1 }
  0xc0   :  { %v464_v51 = vadd.f32 %v2257_v41, %v463_v25  ;;  %v568_v25 = vpack.c.b16 %v563_v59, %v563_v59  ;;  %v2361_v59 = vld [vmem:[%s2809_s0 + $0x78] sm:$0xff] }
  0xc2   :  { %612 = vmatmul.bf16.vlgmr.msrb.gmra.mxu0 %v568_v25  ;;  %809 = vmatpush.bf16.msrb.mxu3 %v1913_v1 }
  0xc3   :  { %852 = vmatpush.bf16.msra.mxu1 %v2122_v47 }
  0xc6   :  { %v476_v45 = vpop.f32.mrf.mxu2  ;;  %810 = vmatpush.bf16.msrb.mxu3 %v1935_v5 }
  0xc7   :  { %853 = vmatpush.bf16.msra.mxu1 %v2131_v48  ;;  %v465_v43 = vpop.f32.mrf.mxu1  ;;  %v489_v46 = vpop.f32.mrf.mxu3  ;;  %v477_v53 = vadd.f32 %v476_v45, %v464_v51  ;;  %v783_v45 = vunpack.c.l.b16 %v1677_v40  ;;  %v659_v51 = vunpack.c.h.b16 %v2268_v50  ;;  %v1698_v40 = vld [vmem:[%s2809_s0 + $0x9c] sm:$0xf] }
  0xc9   :  { %v490_v60 = vadd.f32 %v489_v46, %v477_v53  ;;  %v788_v46 = vpack.c.b16 %v783_v45, %v783_v45  ;;  %v562_v53 = vunpack.c.h.b16 %v2293_v35 }
  0xca   :  { %811 = vmatpush.bf16.msrb.mxu3 %v1959_v9 }
  0xcb   :  { %854 = vmatpush.bf16.msra.mxu1 %v2140_v49  ;;  %v567_v58 = vpack.c.b16 %v562_v53, %v562_v53 }
  0xce   :  { %v478_v55 = vpop.f32.mrf.mxu2  ;;  %812 = vmatpush.bf16.msrb.mxu3 %v1983_v13 }
  0xcf   :  { %855 = vmatpush.bf16.msra.mxu1 %v2152_v52  ;;  %v491_v56 = vpop.f32.mrf.mxu3  ;;  %v664_v55 = vpack.c.b16 %v659_v51, %v659_v51  ;;  %v1809_v51 = vld [vmem:[%s2810_s3 + $0x28] sm:$0xff] }
  0xd0   :  { %v657_v56 = vunpack.c.h.b16 %v1662_v54 }
  0xd1   :  { %720 = vmatmul.bf16.vlgmr.msra.gmra.mxu3 %v664_v55 }
  0xd2   :  { %1678 = vmatmul.msk.bf16.vlgmr.msra.gmra.mxu1 %vm351_vm1, %v788_v46  ;;  %v662_v57 = vpack.c.b16 %v657_v56, %v657_v56  ;;  %813 = vmatpush.bf16.msrb.mxu3 %v2007_v17  ;;  %v1810_v56 = vld [vmem:[%s2810_s3 + $0x30] sm:$0xff] }
  0xd3   :  { %930 = vmatpush.bf16.msrb.mxu1 %v1923_v3 }
  0xd4   :  { %694 = vmatmul.bf16.vlgmr.msra.gmra.mxu0 %v662_v57 }
  0xd6   :  { %v502_v61 = vpop.f32.mrf.mxu0  ;;  %814 = vmatpush.bf16.msrb.mxu3 %v2034_v22 }
  0xd7   :  { %931 = vmatpush.bf16.msrb.mxu1 %v1947_v7  ;;  %v515_v62 = vpop.f32.mrf.mxu1  ;;  %v503_v30 = vadd.f32 %v502_v61, %v490_v60  ;;  %v998_v60 = vunpack.c.h.b16 %v2361_v59 }
  0xd9   :  { %v516_v32 = vadd.f32 %v515_v62, %v503_v30  ;;  %v1003_v61 = vpack.c.b16 %v998_v60, %v998_v60  ;;  %v1664_v62 = vld [vmem:[%s2809_s0 + $0x4c] sm:$0xf] }
  0xda   :  { %815 = vmatpush.bf16.msrb.mxu3 %v2058_v27  ;;  %v660_v25 = vunpack.c.l.b16 %v1664_v62 }
  0xdb   :  { %932 = vmatpush.bf16.msrb.mxu1 %v1971_v11  ;;  %v519_v36 = vmax.f32 %v516_v32, 0.0  ;;  %v2390_v32 = vld [vmem:[%s2809_s0 + $0x8c] sm:$0xff] }
  0xdc   :  { %v665_v30 = vpack.c.b16 %v660_v25, %v660_v25 }
  0xdd   :  { %v520_v31 = vpack.c.bf16 %v519_v36, %v519_v36  ;;  %v1092_v36 = vunpack.c.l.b16 %v2390_v32 }
  0xde   :  { %v504_v42 = vpop.f32.mrf.mxu0  ;;  %816 = vmatpush.bf16.msrb.mxu3 %v2088_v34 }
  0xdf   :  { %933 = vmatpush.bf16.msrb.mxu1 %v1995_v15  ;;  %v517_v43 = vpop.f32.mrf.mxu1  ;;  %1657 = vmatmul.msk.bf16.vlgmr.msra.gmra.mxu2 %vm537_vm2, %v520_v31  ;;  %v1097_v31 = vpack.c.b16 %v1092_v36, %v1092_v36  ;;  %v1096_v42 = vunpack.c.l.b16 %v1698_v40 }
  0xe0   :  { %673 = vmatpush.bf16.msra.mxu2 %v1908_v0 }
  0xe1   :  { %v1101_v43 = vpack.c.b16 %v1096_v42, %v1096_v42 }
  0xe2   :  { %891 = vmatpush.bf16.msra.mxu3 %v1908_v0 }
  0xe3   :  { %934 = vmatpush.bf16.msrb.mxu1 %v2019_v19 }
  0xe4   :  { %674 = vmatpush.bf16.msra.mxu2 %v1930_v4 }
  0xe6   :  { %892 = vmatpush.bf16.msra.mxu3 %v1930_v4 }
  0xe7   :  { %935 = vmatpush.bf16.msrb.mxu1 %v2046_v24 }
  0xe8   :  { %675 = vmatpush.bf16.msra.mxu2 %v1954_v8 }
  0xea   :  { %893 = vmatpush.bf16.msra.mxu3 %v1954_v8 }
  0xeb   :  { %936 = vmatpush.bf16.msrb.mxu1 %v2070_v29 }
  0xec   :  { %676 = vmatpush.bf16.msra.mxu2 %v1978_v12 }
  0xee   :  { %894 = vmatpush.bf16.msra.mxu3 %v1978_v12 }
  0xef   :  { %937 = vmatpush.bf16.msrb.mxu1 %v2102_v39  ;;  %599 = vmatmul.bf16.vlgmr.msrb.gmra.mxu2 %v567_v58 }
  0xf0   :  { %677 = vmatpush.bf16.msra.mxu2 %v2002_v16 }
  0xf2   :  { %895 = vmatpush.bf16.msra.mxu3 %v2002_v16 }
  0xf3   :  { %1027 = vmatpush.bf16.msra.mxu1 %v1913_v1  ;;  %v2347_v1 = vld [vmem:[%s2809_s0 + $0x6c] sm:$0xff] }
  0xf4   :  { %678 = vmatpush.bf16.msra.mxu2 %v2029_v21 }
  0xf6   :  { %896 = vmatpush.bf16.msra.mxu3 %v2029_v21 }
  0xf7   :  { %1028 = vmatpush.bf16.msra.mxu1 %v1935_v5  ;;  %v877_v5 = vunpack.c.h.b16 %v2347_v1 }
  0xf8   :  { %679 = vmatpush.bf16.msra.mxu2 %v2053_v26 }
  0xf9   :  { %v882_v50 = vpack.c.b16 %v877_v5, %v877_v5 }
  0xfa   :  { %897 = vmatpush.bf16.msra.mxu3 %v2053_v26 }
  0xfb   :  { %1029 = vmatpush.bf16.msra.mxu1 %v1959_v9  ;;  %v656_v9 = vunpack.c.l.b16 %v1662_v54  ;;  %v1808_v54 = vld [vmem:[%s2810_s3 + $0x20] sm:$0xff] }
  0xfc   :  { %938 = vmatmul.bf16.vlgmr.msrb.gmra.mxu1 %v882_v50  ;;  %680 = vmatpush.bf16.msra.mxu2 %v2083_v33 }
  0xfd   :  { %v661_v35 = vpack.c.b16 %v656_v9, %v656_v9 }
  0xfe   :  { %898 = vmatpush.bf16.msra.mxu3 %v2083_v33 }
  0xff   :  { %1030 = vmatpush.bf16.msra.mxu1 %v1983_v13  ;;  %681 = vmatmul.bf16.vlgmr.msra.gmra.mxu2 %v661_v35  ;;  %v780_v35 = vunpack.c.h.b16 %v2287_v20 }
 0x100   :  { %727 = vmatpush.bf16.msrb.mxu2 %v2092_v37 }
 0x101   :  { %v785_v60 = vpack.c.b16 %v780_v35, %v780_v35 }
 0x103   :  { %1031 = vmatpush.bf16.msra.mxu1 %v2007_v17  ;;  %817 = vmatmul.bf16.vlgmr.msrb.gmra.mxu3 %v785_v60  ;;  %v876_v60 = vunpack.c.l.b16 %v2347_v1 }
 0x104   :  { %728 = vmatpush.bf16.msrb.mxu2 %v2111_v44  ;;  %945 = vmatpush.bf16.msrb.mxu3 %v2092_v37 }
 0x107   :  { %1032 = vmatpush.bf16.msra.mxu1 %v2034_v22 }
 0x108   :  { %729 = vmatpush.bf16.msrb.mxu2 %v2122_v47  ;;  %946 = vmatpush.bf16.msrb.mxu3 %v2111_v44 }
 0x10b   :  { %1033 = vmatpush.bf16.msra.mxu1 %v2058_v27 }
 0x10c   :  { %730 = vmatpush.bf16.msrb.mxu2 %v2131_v48  ;;  %947 = vmatpush.bf16.msrb.mxu3 %v2122_v47 }
 0x10f   :  { %1034 = vmatpush.bf16.msra.mxu1 %v2088_v34 }
 0x110   :  { %731 = vmatpush.bf16.msrb.mxu2 %v2140_v49  ;;  %948 = vmatpush.bf16.msrb.mxu3 %v2131_v48 }
 0x112   :  { %1035 = vmatmul.bf16.vlgmr.msra.gmra.mxu1 %v1003_v61 }
 0x113   :  { %1109 = vmatpush.bf16.msrb.mxu1 %v1908_v0 }
 0x114   :  { %732 = vmatpush.bf16.msrb.mxu2 %v2152_v52  ;;  %949 = vmatpush.bf16.msrb.mxu3 %v2140_v49 }
 0x117   :  { %1110 = vmatpush.bf16.msrb.mxu1 %v1930_v4  ;;  %1665 = vmatmul.msk.bf16.vlgmr.msrb.gmra.mxu2 %vm351_vm1, %v665_v30 }
 0x118   :  { %835 = vmatpush.bf16.msra.mxu2 %v1923_v3  ;;  %950 = vmatpush.bf16.msrb.mxu3 %v2152_v52 }
 0x11b   :  { %1111 = vmatpush.bf16.msrb.mxu1 %v1954_v8 }
 0x11c   :  { %836 = vmatpush.bf16.msra.mxu2 %v1947_v7 }
 0x11f   :  { %1112 = vmatpush.bf16.msrb.mxu1 %v1978_v12 }
 0x120   :  { %837 = vmatpush.bf16.msra.mxu2 %v1971_v11 }
 0x123   :  { %1113 = vmatpush.bf16.msrb.mxu1 %v2002_v16 }
 0x124   :  { %838 = vmatpush.bf16.msra.mxu2 %v1995_v15 }
 0x127   :  { %1114 = vmatpush.bf16.msrb.mxu1 %v2029_v21 }
 0x128   :  { %839 = vmatpush.bf16.msra.mxu2 %v2019_v19 }
 0x12b   :  { %1115 = vmatpush.bf16.msrb.mxu1 %v2053_v26 }
 0x12c   :  { %840 = vmatpush.bf16.msra.mxu2 %v2046_v24 }
 0x12f   :  { %1116 = vmatpush.bf16.msrb.mxu1 %v2083_v33 }
 0x130   :  { %841 = vmatpush.bf16.msra.mxu2 %v2070_v29 }
 0x132   :  { %1117 = vmatmul.bf16.vlgmr.msrb.gmra.mxu1 %v1097_v31 }
 0x133   :  { %1163 = vmatpush.bf16.msra.mxu1 %v2092_v37 }
 0x134   :  { %842 = vmatpush.bf16.msra.mxu2 %v2102_v39 }
 0x137   :  { %1164 = vmatpush.bf16.msra.mxu1 %v2111_v44 }
 0x138   :  { %917 = vmatpush.bf16.msrb.mxu2 %v1918_v2 }
 0x13b   :  { %1165 = vmatpush.bf16.msra.mxu1 %v2122_v47 }
 0x13c   :  { %918 = vmatpush.bf16.msrb.mxu2 %v1942_v6 }
 0x13f   :  { %1166 = vmatpush.bf16.msra.mxu1 %v2131_v48  ;;  %v613_v46 = vpop.f32.mrf.mxu0 }
 0x140   :  { %919 = vmatpush.bf16.msrb.mxu2 %v1966_v10 }
 0x143   :  { %1167 = vmatpush.bf16.msra.mxu1 %v2140_v49 }
 0x144   :  { %920 = vmatpush.bf16.msrb.mxu2 %v1990_v14 }
 0x147   :  { %1168 = vmatpush.bf16.msra.mxu1 %v2152_v52 }
 0x148   :  { %921 = vmatpush.bf16.msrb.mxu2 %v2014_v18 }
 0x14a   :  { %1699 = vmatmul.msk.bf16.vlgmr.msra.gmra.mxu1 %vm351_vm1, %v1101_v43 }
 0x14b   :  { %1271 = vmatpush.bf16.msrb.mxu1 %v1923_v3  ;;  %v587_v3 = vpop.f32.mrf.mxu3 }
 0x14c   :  { %922 = vmatpush.bf16.msrb.mxu2 %v2041_v23  ;;  %v588_v25 = vadd.f32 %v2257_v41, %v587_v3 }
 0x14f   :  { %1272 = vmatpush.bf16.msrb.mxu1 %v1947_v7  ;;  %v626_v7 = vpop.f32.mrf.mxu1 }
 0x150   :  { %923 = vmatpush.bf16.msrb.mxu2 %v2065_v28 }
 0x153   :  { %1273 = vmatpush.bf16.msrb.mxu1 %v1971_v11  ;;  %v2431_v11 = vld [vmem:[%s2809_s0 + $0xa8] sm:$0xff]  ;;  %v589_v45 = vpop.f32.mrf.mxu3 }
 0x154   :  { %924 = vmatpush.bf16.msrb.mxu2 %v2097_v38 }
 0x157   :  { %1274 = vmatpush.bf16.msrb.mxu1 %v1995_v15  ;;  %v1218_v15 = vunpack.c.h.b16 %v2431_v11 }
 0x15b   :  { %1275 = vmatpush.bf16.msrb.mxu1 %v2019_v19  ;;  %v1223_v19 = vpack.c.b16 %v1218_v15, %v1218_v15  ;;  %v639_v53 = vpop.f32.mrf.mxu3 }
 0x15f   :  { %1276 = vmatpush.bf16.msrb.mxu1 %v2046_v24  ;;  %v628_v24 = vpop.f32.mrf.mxu1 }
 0x162   :  { %v2451_v58 = vpop.f32.mrf.mxu2 }
 0x163   :  { %1277 = vmatpush.bf16.msrb.mxu1 %v2070_v29  ;;  %v1811_v29 = vld [vmem:[%s2810_s3 + $0x38] sm:$0xff]  ;;  %v641_v57 = vpop.f32.mrf.mxu3 }
 0x164   :  { %765 = vmatpush.bf16.msrb.mxu0 %v1811_v29 }
 0x167   :  { %1278 = vmatpush.bf16.msrb.mxu1 %v2102_v39  ;;  %v2446_v55 = vpop.f32.mrf.mxu1  ;;  %v615_v39 = vpop.f32.mrf.mxu0 }
 0x168   :  { %766 = vmatpush.bf16.msrb.mxu0 %v1810_v56 }
 0x16a   :  { %1279 = vmatmul.bf16.vlgmr.msrb.gmra.mxu1 %v1223_v19  ;;  %v552_v9 = vpop.f32.mrf.mxu2 }
 0x16b   :  { %1380 = vmatpush.bf16.msra.mxu1 %v1809_v51  ;;  %v721_v61 = vpop.f32.mrf.mxu3 }
 0x16c   :  { %822 = vmatpush.bf16.msra.mxu0 %v1918_v2 }
 0x16f   :  { %1381 = vmatpush.bf16.msra.mxu1 %v1808_v54  ;;  %v710_v5 = vpop.f32.mrf.mxu1  ;;  %v695_v50 = vpop.f32.mrf.mxu0 }
 0x170   :  { %823 = vmatpush.bf16.msra.mxu0 %v1942_v6 }
 0x172   :  { %v600_v30 = vpop.f32.mrf.mxu2 }
 0x173   :  { %v601_v31 = vadd.f32 %v600_v30, %v588_v25  ;;  %v723_v20 = vpop.f32.mrf.mxu3 }
 0x174   :  { %824 = vmatpush.bf16.msra.mxu0 %v1966_v10 }
 0x175   :  { %v614_v40 = vadd.f32 %v613_v46, %v601_v31  ;;  %v2473_v46 = vld [vmem:[%s2809_s0 + $0x58] sm:$0xff] }
 0x177   :  { %v2457_v62 = vpop.f32.mrf.mxu1  ;;  %v697_v36 = vpop.f32.mrf.mxu0  ;;  %v627_v43 = vadd.f32 %v626_v7, %v614_v40  ;;  %v782_v7 = vunpack.c.h.b16 %v2473_v46 }
 0x178   :  { %825 = vmatpush.bf16.msra.mxu0 %v1990_v14  ;;  %v806_v36 = vadd.f32 %v2257_v41, %v2457_v62  ;;  %v1832_v62 = vld [vmem:[%s2807_s1 + $0xf8] sm:$0xff] }
 0x179   :  { %v640_v15 = vadd.f32 %v639_v53, %v627_v43  ;;  %v787_v51 = vpack.c.b16 %v782_v7, %v782_v7  ;;  %v2482_v53 = vld [vmem:[%s2809_s0 + $0x64] sm:$0xff] }
 0x17a   :  { %v602_v19 = vpop.f32.mrf.mxu2  ;;  %v874_v54 = vunpack.c.l.b16 %v2482_v53 }
 0x17b   :  { %v643_v3 = vmax.f32 %v640_v15, 0.0  ;;  %843 = vmatmul.bf16.vlgmr.msra.gmra.mxu2 %v787_v51  ;;  %v1835_v51 = vld [vmem:[%s2807_s1 + $0xe0] sm:$0xff] }
 0x17c   :  { %826 = vmatpush.bf16.msra.mxu0 %v2014_v18  ;;  %1014 = vmatpush.bf16.msra.mxu2 %v1908_v0  ;;  %v879_v39 = vpack.c.b16 %v874_v54, %v874_v54  ;;  %v881_v0 = vpack.c.b16 %v876_v60, %v876_v60  ;;  %v1836_v54 = vld [vmem:[%s2807_s1 + $0xd8] sm:$0xff] }
 0x17d   :  { %v644_v45 = vpack.c.bf16 %v643_v3, %v643_v3  ;;  %v1833_v3 = vld [vmem:[%s2807_s1 + $0xf0] sm:$0xff] }
 0x17e   :  { %899 = vmatmul.bf16.vlgmr.msra.gmra.mxu3 %v879_v39 }
 0x17f   :  { %v807_v42 = vpop.f32.mrf.mxu1  ;;  %1739 = vmatmul.msk.bf16.vlgmr.msra.gmra.mxu1 %vm537_vm2, %v644_v45  ;;  %1040 = vmatpush.bf16.msra.mxu3 %v1918_v2  ;;  %v1681_v2 = vld [vmem:[%s2809_s0 + $0x74] sm:$0xf] }
 0x180   :  { %827 = vmatpush.bf16.msra.mxu0 %v2041_v23  ;;  %1015 = vmatpush.bf16.msra.mxu2 %v1930_v4  ;;  %v1815_v42 = vld [vmem:[%s2810_s3 + $0x58] sm:$0xff] }
 0x182   :  { %v682_v29 = vpop.f32.mrf.mxu2 }
 0x183   :  { %v683_v57 = vadd.f32 %v2257_v41, %v682_v29  ;;  %1041 = vmatpush.bf16.msra.mxu3 %v1942_v6 }
 0x184   :  { %828 = vmatpush.bf16.msra.mxu0 %v2065_v28  ;;  %1016 = vmatpush.bf16.msra.mxu2 %v1954_v8  ;;  %v878_v8 = vunpack.c.l.b16 %v1681_v2  ;;  %v1693_v2 = vld [vmem:[%s2809_s0 + $0x80] sm:$0xff] }
 0x185   :  { %v696_v35 = vadd.f32 %v695_v50, %v683_v57 }
 0x186   :  { %v883_v6 = vpack.c.b16 %v878_v8, %v878_v8  ;;  %v818_v31 = vpop.f32.mrf.mxu3  ;;  %v1839_v8 = vld [vmem:[%s2807_s1 + $0xc0] sm:$0xff] }
 0x187   :  { %v2468_v24 = vpop.f32.mrf.mxu1  ;;  %1042 = vmatpush.bf16.msra.mxu3 %v1966_v10  ;;  %v709_v4 = vadd.f32 %v2446_v55, %v696_v35  ;;  %v819_v40 = vadd.f32 %v818_v31, %v806_v36  ;;  %v1837_v35 = vld [vmem:[%s2807_s1 + $0xd0] sm:$0xff] }
 0x188   :  { %829 = vmatpush.bf16.msra.mxu0 %v2097_v38  ;;  %1017 = vmatpush.bf16.msra.mxu2 %v1978_v12 }
 0x189   :  { %v722_v1 = vadd.f32 %v721_v61, %v709_v4  ;;  %v2514_v61 = vld [vmem:[%s2807_s1 + $0x78] sm:$0xff]  ;;  %v999_v4 = vunpack.c.l.b16 %v1693_v2 }
 0x18a   :  { %v684_v5 = vpop.f32.mrf.mxu2 }
 0x18b   :  { %925 = vmatmul.bf16.vlgmr.msrb.gmra.mxu2 %v881_v0  ;;  %1043 = vmatpush.bf16.msra.mxu3 %v1990_v14 }
 0x18c   :  { %1018 = vmatpush.bf16.msra.mxu2 %v2002_v16 }
 0x18e   :  { %1682 = vmatmul.msk.bf16.vlgmr.msrb.gmra.mxu3 %vm351_vm1, %v883_v6  ;;  %v1004_v6 = vpack.c.b16 %v999_v4, %v999_v4 }
 0x18f   :  { %v859_v56 = vpop.f32.mrf.mxu1  ;;  %1044 = vmatpush.bf16.msra.mxu3 %v2014_v18  ;;  %v2523_v18 = vld [vmem:[%s2807_s1 + $0x70] sm:$0xff] }
 0x190   :  { %1019 = vmatpush.bf16.msra.mxu2 %v2029_v21 }
 0x193   :  { %1045 = vmatpush.bf16.msra.mxu3 %v2041_v23  ;;  %v781_v23 = vunpack.c.l.b16 %v2473_v46  ;;  %v1834_v46 = vld [vmem:[%s2807_s1 + $0xe8] sm:$0xff] }
 0x194   :  { %1020 = vmatpush.bf16.msra.mxu2 %v2053_v26  ;;  %v2533_v26 = vld [vmem:[%s2807_s1 + $0x68] sm:$0xff] }
 0x197   :  { %v2492_v9 = vpop.f32.mrf.mxu1  ;;  %1046 = vmatpush.bf16.msra.mxu3 %v2065_v28  ;;  %v786_v28 = vpack.c.b16 %v781_v23, %v781_v23 }
 0x198   :  { %1021 = vmatpush.bf16.msra.mxu2 %v2083_v33 }
 0x19a   :  { %v734_v12 = vpop.f32.mrf.mxu2 }
 0x19b   :  { %v735_v10 = vadd.f32 %v734_v12, %v722_v1  ;;  %1047 = vmatpush.bf16.msra.mxu3 %v2097_v38  ;;  %v2548_v38 = vld [vmem:[%s2807_s1 + $0x60] sm:$0xff] }
 0x19c   :  { %1068 = vmatpush.bf16.msrb.mxu2 %v2092_v37 }
 0x19d   :  { %v738_v25 = vmax.f32 %v735_v10, 0.0 }
 0x19e   :  { %1048 = vmatmul.bf16.vlgmr.msra.gmra.mxu3 %v1004_v6  ;;  %v1813_v6 = vld [vmem:[%s2810_s3 + $0x48] sm:$0xff] }
 0x19f   :  { %v941_v50 = vpop.f32.mrf.mxu1  ;;  %v739_v55 = vpack.c.bf16 %v738_v25, %v738_v25  ;;  %1122 = vmatpush.bf16.msrb.mxu3 %v2514_v61 }
 0x1a0   :  { %1069 = vmatpush.bf16.msrb.mxu2 %v2111_v44  ;;  %v2556_v44 = vld [vmem:[%s2807_s1 + $0x58] sm:$0xff]  ;;  %v1694_v50 = vld [vmem:[%s2809_s0 + $0x88] sm:$0xf] }
 0x1a1   :  { %1674 = vmatmul.msk.bf16.vlgmr.msrb.gmra.mxu0 %vm537_vm2, %v739_v55  ;;  %v1001_v1 = vunpack.c.l.b16 %v1694_v50 }
 0x1a2   :  { %v736_v14 = vpop.f32.mrf.mxu2  ;;  %904 = vmatpush.bf16.msrb.mxu0 %v2514_v61 }
 0x1a3   :  { %1123 = vmatpush.bf16.msrb.mxu3 %v2523_v18  ;;  %v1006_v10 = vpack.c.b16 %v1001_v1, %v1001_v1  ;;  %v1863_v1 = vld [vmem:[%s2807_s1 + $0x100] sm:$0xff] }
 0x1a4   :  { %1070 = vmatpush.bf16.msrb.mxu2 %v2122_v47 }
 0x1a6   :  { %905 = vmatpush.bf16.msrb.mxu0 %v2523_v18 }
 0x1a7   :  { %v2508_v16 = vpop.f32.mrf.mxu1  ;;  %1124 = vmatpush.bf16.msrb.mxu3 %v2533_v26 }
 0x1a8   :  { %1071 = vmatpush.bf16.msrb.mxu2 %v2131_v48 }
 0x1aa   :  { %906 = vmatpush.bf16.msrb.mxu0 %v2533_v26 }
 0x1ab   :  { %1125 = vmatpush.bf16.msrb.mxu3 %v2548_v38 }
 0x1ac   :  { %1072 = vmatpush.bf16.msrb.mxu2 %v2140_v49 }
 0x1ae   :  { %907 = vmatpush.bf16.msrb.mxu0 %v1983_v13 }
 0x1af   :  { %v1038_v21 = vpop.f32.mrf.mxu1  ;;  %1126 = vmatpush.bf16.msrb.mxu3 %v2556_v44 }
 0x1b0   :  { %1073 = vmatpush.bf16.msrb.mxu2 %v2152_v52  ;;  %v1093_v21 = vunpack.c.h.b16 %v2390_v32 }
 0x1b1   :  { %830 = vmatmul.bf16.vlgmr.msra.gmra.mxu0 %v786_v28  ;;  %v1697_v28 = vld [vmem:[%s2809_s0 + $0x94] sm:$0xff] }
 0x1b2   :  { %908 = vmatpush.bf16.msrb.mxu0 %v2007_v17  ;;  %v875_v17 = vunpack.c.h.b16 %v2482_v53  ;;  %v997_v53 = vunpack.c.l.b16 %v2361_v59  ;;  %v1838_v59 = vld [vmem:[%s2807_s1 + $0xc8] sm:$0xff]  ;;  %v1098_v23 = vpack.c.b16 %v1093_v21, %v1093_v21 }
 0x1b3   :  { %1127 = vmatpush.bf16.msrb.mxu3 %v2034_v22 }
 0x1b4   :  { %v880_v47 = vpack.c.b16 %v875_v17, %v875_v17  ;;  %v1002_v39 = vpack.c.b16 %v997_v53, %v997_v53  ;;  %v1854_v53 = vld [vmem:[%s2807_s1 + $0x20] sm:$0xff] }
 0x1b6   :  { %909 = vmatpush.bf16.msrb.mxu0 %v2034_v22  ;;  %v820_v22 = vpop.f32.mrf.mxu3  ;;  %1022 = vmatmul.bf16.vlgmr.msra.gmra.mxu2 %v1002_v39  ;;  %v1709_v39 = vld [vmem:[%s2809_s0 + $0xa0] sm:$0xff] }
 0x1b7   :  { %v2540_v33 = vpop.f32.mrf.mxu1  ;;  %1128 = vmatpush.bf16.msrb.mxu3 %v2058_v27  ;;  %1148 = vmatpush.bf16.msra.mxu2 %v1832_v62 }
 0x1ba   :  { %910 = vmatpush.bf16.msrb.mxu0 %v2058_v27 }
 0x1bb   :  { %1129 = vmatpush.bf16.msrb.mxu3 %v2088_v34  ;;  %1149 = vmatpush.bf16.msra.mxu2 %v1833_v3 }
 0x1be   :  { %911 = vmatpush.bf16.msrb.mxu0 %v2088_v34  ;;  %v1814_v34 = vld [vmem:[%s2810_s3 + $0x50] sm:$0xff]  ;;  %1130 = vmatmul.bf16.vlgmr.msrb.gmra.mxu3 %v1098_v23 }
 0x1bf   :  { %v1120_v13 = vpop.f32.mrf.mxu1  ;;  %1150 = vmatpush.bf16.msra.mxu2 %v1834_v46 }
 0x1c0   :  { %v1095_v13 = vunpack.c.h.b16 %v1697_v28 }
 0x1c1   :  { %912 = vmatmul.bf16.vlgmr.msrb.gmra.mxu0 %v880_v47 }
 0x1c2   :  { %983 = vmatpush.bf16.msra.mxu0 %v1815_v42 }
 0x1c3   :  { %1151 = vmatpush.bf16.msra.mxu2 %v1835_v51 }
 0x1c6   :  { %984 = vmatpush.bf16.msra.mxu0 %v1814_v34  ;;  %1695 = vmatmul.msk.bf16.vlgmr.msrb.gmra.mxu2 %vm351_vm1, %v1006_v10  ;;  %v2661_v34 = vld [vmem:[%s2807_s1 + $0x98] sm:$0xff] }
 0x1c7   :  { %v2563_v48 = vpop.f32.mrf.mxu1  ;;  %1152 = vmatpush.bf16.msra.mxu2 %v1836_v54 }
 0x1ca   :  { %1053 = vmatpush.bf16.msrb.mxu0 %v1832_v62  ;;  %v1094_v62 = vunpack.c.l.b16 %v1697_v28 }
 0x1cb   :  { %1153 = vmatpush.bf16.msra.mxu2 %v1837_v35 }
 0x1ce   :  { %1054 = vmatpush.bf16.msrb.mxu0 %v1833_v3  ;;  %v1099_v3 = vpack.c.b16 %v1094_v62, %v1094_v62 }
 0x1cf   :  { %v1172_v49 = vpop.f32.mrf.mxu1  ;;  %1154 = vmatpush.bf16.msra.mxu2 %v1838_v59 }
 0x1d0   :  { %v1100_v49 = vpack.c.b16 %v1095_v13, %v1095_v13 }
 0x1d2   :  { %1055 = vmatpush.bf16.msrb.mxu0 %v1834_v46  ;;  %v1851_v46 = vld [vmem:[%s2807_s1 + $0x38] sm:$0xff] }
 0x1d3   :  { %1155 = vmatpush.bf16.msra.mxu2 %v1839_v8 }
 0x1d6   :  { %1056 = vmatpush.bf16.msrb.mxu0 %v1835_v51  ;;  %1156 = vmatmul.bf16.vlgmr.msra.gmra.mxu2 %v1100_v49  ;;  %v1853_v51 = vld [vmem:[%s2807_s1 + $0x28] sm:$0xff] }
 0x1d7   :  { %1245 = vmatpush.bf16.msrb.mxu2 %v2514_v61  ;;  %v2627_v61 = vld [vmem:[%s2807_s1 + $0xb8] sm:$0xff] }
 0x1da   :  { %1057 = vmatpush.bf16.msrb.mxu0 %v1836_v54  ;;  %v1856_v54 = vld [vmem:[%s2807_s1 + $0x10] sm:$0xff] }
 0x1db   :  { %1246 = vmatpush.bf16.msrb.mxu2 %v2523_v18  ;;  %v1842_v18 = vld [vmem:[%s2807_s1 + $0x50] sm:$0xff] }
 0x1de   :  { %1058 = vmatpush.bf16.msrb.mxu0 %v1837_v35 }
 0x1df   :  { %1247 = vmatpush.bf16.msrb.mxu2 %v2533_v26  ;;  %v1000_v26 = vunpack.c.h.b16 %v1693_v2  ;;  %v1861_v2 = vld [vmem:[%s2807_s1 + $0x110] sm:$0xff] }
 0x1e1   :  { %v1005_v42 = vpack.c.b16 %v1000_v26, %v1000_v26 }
 0x1e2   :  { %1059 = vmatpush.bf16.msrb.mxu0 %v1838_v59  ;;  %v1859_v59 = vld [vmem:[%s2807_s1 + $0x120] sm:$0xff] }
 0x1e3   :  { %1248 = vmatpush.bf16.msrb.mxu2 %v2548_v38  ;;  %v2643_v38 = vld [vmem:[%s2807_s1 + $0xa8] sm:$0xff] }
 0x1e6   :  { %1060 = vmatpush.bf16.msrb.mxu0 %v1839_v8  ;;  %v1862_v8 = vld [vmem:[%s2807_s1 + $0x108] sm:$0xff] }
 0x1e7   :  { %v2567_v52 = vpop.f32.mrf.mxu1  ;;  %1249 = vmatpush.bf16.msrb.mxu2 %v2556_v44  ;;  %v1844_v44 = vld [vmem:[%s2807_s1 + $0x48] sm:$0xff] }
 0x1eb   :  { %1250 = vmatpush.bf16.msrb.mxu2 %v1842_v18  ;;  %v1216_v18 = vunpack.c.h.b16 %v1709_v39 }
 0x1ed   :  { %v1221_v26 = vpack.c.b16 %v1216_v18, %v1216_v18 }
 0x1ef   :  { %v1282_v30 = vpop.f32.mrf.mxu1  ;;  %1251 = vmatpush.bf16.msrb.mxu2 %v1844_v44 }
 0x1fc   :  { %v1383_v20 = vpop.f32.mrf.mxu1 }
 0x1fe   :  { %v844_v27 = vpop.f32.mrf.mxu2 }
 0x201   :  { %v900_v15 = vpop.f32.mrf.mxu3 }
 0x202   :  { %v901_v17 = vadd.f32 %v2257_v41, %v900_v15  ;;  %v2667_v15 = vld [vmem:[%s2807_s1 + $0x90] sm:$0xff] }
 0x204   :  { %v1385_v43 = vpop.f32.mrf.mxu1 }
 0x205   :  { %v2652_v43 = vld [vmem:[%s2807_s1 + $0xa0] sm:$0xff] }
 0x206   :  { %v846_v19 = vpop.f32.mrf.mxu2 }
 0x207   :  { %v2673_v19 = vld [vmem:[%s2807_s1 + $0x88] sm:$0xff] }
 0x209   :  { %v902_v45 = vpop.f32.mrf.mxu3 }
 0x20a   :  { %v2679_v45 = vld [vmem:[%s2807_s1 + $0x80] sm:$0xff] }
 0x20e   :  { %v926_v7 = vpop.f32.mrf.mxu2 }
 0x211   :  { %v952_v29 = vpop.f32.mrf.mxu3 }
 0x216   :  { %v928_v5 = vpop.f32.mrf.mxu2 }
 0x217   :  { %v1857_v5 = vld [vmem:[%s2807_s1 + $0x8] sm:$0xff] }
 0x219   :  { %v954_v60 = vpop.f32.mrf.mxu3 }
 0x21a   :  { %v1858_v60 = vld [vmem:[%s2807_s1] sm:$0xff] }
 0x21e   :  { %v768_v56 = vpop.f32.mrf.mxu0 }
 0x21f   :  { %v2593_v57 = vadd.f32 %v1383_v20, %v768_v56  ;;  %v1215_v56 = vunpack.c.l.b16 %v1709_v39 }
 0x221   :  { %v1220_v35 = vpack.c.b16 %v1215_v56, %v1215_v56 }
 0x226   :  { %v770_v0 = vpop.f32.mrf.mxu0 }
 0x227   :  { %v1860_v0 = vld [vmem:[%s2807_s1 + $0x118] sm:$0xff] }
 0x22e   :  { %v831_v12 = vpop.f32.mrf.mxu0 }
 0x22f   :  { %v832_v25 = vadd.f32 %v831_v12, %v819_v40  ;;  %v1812_v12 = vld [vmem:[%s2810_s3 + $0x40] sm:$0xff] }
 0x231   :  { %v2611_v55 = vadd.f32 %v844_v27, %v832_v25  ;;  %v1846_v27 = vld [vmem:[%s2807_s1 + $0x40] sm:$0xff] }
 0x232   :  { %1252 = vmatpush.bf16.msrb.mxu2 %v1846_v27 }
 0x233   :  { %v858_v25 = vadd.f32 %v2468_v24, %v2611_v55  ;;  %v1818_v24 = vld [vmem:[%s2810_s3 + $0x70] sm:$0xff] }
 0x235   :  { %1253 = vmatmul.bf16.vlgmr.msrb.gmra.mxu2 %v1221_v26 }
 0x236   :  { %v833_v14 = vpop.f32.mrf.mxu0 }
 0x237   :  { %v861_v14 = vmax.f32 %v858_v25, 0.0 }
 0x239   :  { %v1023_v10 = vpop.f32.mrf.mxu2  ;;  %v862_v28 = vpack.c.bf16 %v861_v14, %v861_v14 }
 0x23a   :  { %v1024_v21 = vadd.f32 %v2257_v41, %v1023_v10 }
 0x23c   :  { %v1037_v13 = vadd.f32 %v2508_v16, %v1024_v21 }
 0x23e   :  { %v913_v47 = vpop.f32.mrf.mxu0 }
 0x23f   :  { %v914_v30 = vadd.f32 %v913_v47, %v901_v17  ;;  %v1049_v17 = vpop.f32.mrf.mxu3 }
 0x240   :  { %v1050_v47 = vadd.f32 %v1049_v17, %v1037_v13 }
 0x241   :  { %v927_v36 = vadd.f32 %v926_v7, %v914_v30  ;;  %v1852_v7 = vld [vmem:[%s2807_s1 + $0x30] sm:$0xff]  ;;  %v1025_v23 = vpop.f32.mrf.mxu2 }
 0x243   :  { %v940_v32 = vadd.f32 %v2492_v9, %v927_v36  ;;  %v2634_v9 = vld [vmem:[%s2807_s1 + $0xb0] sm:$0xff] }
 0x245   :  { %v953_v31 = vadd.f32 %v952_v29, %v940_v32  ;;  %v1855_v29 = vld [vmem:[%s2807_s1 + $0x18] sm:$0xff] }
 0x246   :  { %v915_v40 = vpop.f32.mrf.mxu0  ;;  %v1819_v32 = vld [vmem:[%s2810_s3 + $0x78] sm:$0xff] }
 0x247   :  { %v956_v22 = vmax.f32 %v953_v31, 0.0  ;;  %v1051_v30 = vpop.f32.mrf.mxu3  ;;  %1201 = vmatpush.bf16.msra.mxu3 %v1819_v32 }
 0x248   :  { %v1822_v30 = vld [vmem:[%s2813_s5] sm:$0xff] }
 0x249   :  { %v957_v20 = vpack.c.bf16 %v956_v22, %v956_v22  ;;  %v1075_v49 = vpop.f32.mrf.mxu2 }
 0x24b   :  { %1691 = vmatmul.msk.bf16.vlgmr.msra.gmra.mxu0 %vm537_vm2, %v957_v20  ;;  %1202 = vmatpush.bf16.msra.mxu3 %v1818_v24 }
 0x24c   :  { %1135 = vmatpush.bf16.msra.mxu0 %v2627_v61 }
 0x24f   :  { %v1131_v31 = vpop.f32.mrf.mxu3  ;;  %1258 = vmatpush.bf16.msrb.mxu3 %v2627_v61 }
 0x250   :  { %1136 = vmatpush.bf16.msra.mxu0 %v2634_v9 }
 0x251   :  { %v1077_v36 = vpop.f32.mrf.mxu2 }
 0x253   :  { %1259 = vmatpush.bf16.msrb.mxu3 %v2634_v9  ;;  %v1119_v9 = vadd.f32 %v2257_v41, %v2540_v33  ;;  %v1804_v41 = vld [vmem:[%s2810_s3] sm:$0xff]  ;;  %v1217_v33 = vunpack.c.l.b16 %v2431_v11 }
 0x254   :  { %1137 = vmatpush.bf16.msra.mxu0 %v2643_v38 }
 0x257   :  { %v1133_v16 = vpop.f32.mrf.mxu3  ;;  %1260 = vmatpush.bf16.msrb.mxu3 %v2643_v38  ;;  %v1132_v38 = vadd.f32 %v1131_v31, %v1119_v9 }
 0x258   :  { %1138 = vmatpush.bf16.msra.mxu0 %v2652_v43  ;;  %v1825_v16 = vld [vmem:[%s2811_s4] ss:$0 sm:$0xff] }
 0x259   :  { %v1157_v55 = vpop.f32.mrf.mxu2 }
 0x25b   :  { %1061 = vmatmul.bf16.vlgmr.msrb.gmra.mxu0 %v1005_v42  ;;  %1261 = vmatpush.bf16.msrb.mxu3 %v2652_v43 }
 0x25c   :  { %1139 = vmatpush.bf16.msra.mxu0 %v2661_v34 }
 0x25f   :  { %1262 = vmatpush.bf16.msrb.mxu3 %v2661_v34 }
 0x260   :  { %1140 = vmatpush.bf16.msra.mxu0 %v2667_v15 }
 0x261   :  { %v1159_v22 = vpop.f32.mrf.mxu2 }
 0x263   :  { %1263 = vmatpush.bf16.msrb.mxu3 %v2667_v15  ;;  %v1805_v15 = vld [vmem:[%s2810_s3 + $0x8] sm:$0xff] }
 0x264   :  { %1141 = vmatpush.bf16.msra.mxu0 %v2673_v19 }
 0x267   :  { %1264 = vmatpush.bf16.msrb.mxu3 %v2673_v19  ;;  %v1222_v19 = vpack.c.b16 %v1217_v33, %v1217_v33 }
 0x268   :  { %1142 = vmatpush.bf16.msra.mxu0 %v2679_v45 }
 0x26b   :  { %1143 = vmatmul.bf16.vlgmr.msra.gmra.mxu0 %v1099_v3  ;;  %1265 = vmatpush.bf16.msrb.mxu3 %v2679_v45  ;;  %v424_v45 = vmax.f32 %v2278_v63, 0.0  ;;  %v1817_v63 = vld [vmem:[%s2810_s3 + $0x68] sm:$0xff] }
 0x26c   :  { %1232 = vmatpush.bf16.msrb.mxu0 %v1851_v46 }
 0x270   :  { %1233 = vmatpush.bf16.msrb.mxu0 %v1852_v7 }
 0x274   :  { %1234 = vmatpush.bf16.msrb.mxu0 %v1853_v51 }
 0x278   :  { %1235 = vmatpush.bf16.msrb.mxu0 %v1854_v53 }
 0x27c   :  { %1236 = vmatpush.bf16.msrb.mxu0 %v1855_v29  ;;  %v425_v29 = vpack.c.bf16 %v424_v45, %v424_v45 }
 0x280   :  { %1237 = vmatpush.bf16.msrb.mxu0 %v1856_v54 }
 0x284   :  { %1238 = vmatpush.bf16.msrb.mxu0 %v1857_v5 }
 0x288   :  { %1239 = vmatpush.bf16.msrb.mxu0 %v1858_v60  ;;  %v1821_v60 = vld [vmem:[%s2810_s3 + $0x88] sm:$0xff] }
 0x289   :  { %1324 = vmatpush.bf16.msra.mxu2 %v1821_v60 }
 0x28b   :  { %1240 = vmatmul.bf16.vlgmr.msrb.gmra.mxu0 %v1220_v35 }
 0x28c   :  { %1286 = vmatpush.bf16.msra.mxu0 %v2092_v37  ;;  %v1711_v37 = vld [vmem:[%s2809_s0 + $0xb0] sm:$0xf] }
 0x28d   :  { %v1219_v4 = vunpack.c.l.b16 %v1711_v37 }
 0x28f   :  { %v1224_v50 = vpack.c.b16 %v1219_v4, %v1219_v4  ;;  %v1864_v4 = vld [vmem:[%s2808_s2] ss:$0 sm:$0xff] }
 0x290   :  { %1287 = vmatpush.bf16.msra.mxu0 %v1859_v59  ;;  %v1820_v59 = vld [vmem:[%s2810_s3 + $0x80] sm:$0xff] }
 0x291   :  { %1325 = vmatpush.bf16.msra.mxu2 %v1820_v59 }
 0x294   :  { %1288 = vmatpush.bf16.msra.mxu0 %v1860_v0 }
 0x295   :  { %1436 = vmatpush.bf16.msrb.mxu2 %v1817_v63 }
 0x298   :  { %1289 = vmatpush.bf16.msra.mxu0 %v1861_v2  ;;  %v1816_v2 = vld [vmem:[%s2810_s3 + $0x60] sm:$0xff] }
 0x299   :  { %1437 = vmatpush.bf16.msrb.mxu2 %v1816_v2 }
 0x29c   :  { %1290 = vmatpush.bf16.msra.mxu0 %v1862_v8 }
 0x2a0   :  { %1291 = vmatpush.bf16.msra.mxu0 %v1863_v1 }
 0x2a3   :  { %1712 = vmatmul.msk.bf16.vlgmr.msra.gmra.mxu0 %vm351_vm1, %v1224_v50 }
 0x2a4   :  { %1408 = vmatpush.bf16.msrb.mxu0 %v1813_v6 }
 0x2a8   :  { %1409 = vmatpush.bf16.msrb.mxu0 %v1812_v12 }
 0x2b3   :  { %1748 = vmatmul.msk.bf16.vlgmr.msrb.gmra.mxu0 %vm537_vm2, %v862_v28 }
 0x2b8   :  { %v1254_v35 = vpop.f32.mrf.mxu2 }
 0x2c0   :  { %v1256_v11 = vpop.f32.mrf.mxu2 }
 0x2c8   :  { %v2747_v40 = vpop.f32.mrf.mxu0 }
 0x2d0   :  { %v988_v20 = vpop.f32.mrf.mxu0 }
 0x2d8   :  { %v1062_v44 = vpop.f32.mrf.mxu0 }
 0x2d9   :  { %v1063_v42 = vadd.f32 %v1062_v44, %v1050_v47 }
 0x2db   :  { %v1076_v61 = vadd.f32 %v1075_v49, %v1063_v42  ;;  %v1826_v42 = vld [vmem:[%s2812_s6] ss:$0 sm:$0xff] }
 0x2dd   :  { %v1079_v17 = vmax.f32 %v1076_v61, 0.0 }
 0x2df   :  { %v1080_v49 = vpack.c.bf16 %v1079_v17, %v1079_v17 }
 0x2e0   :  { %v1064_v27 = vpop.f32.mrf.mxu0 }
 0x2e8   :  { %v1144_v43 = vpop.f32.mrf.mxu0 }
 0x2e9   :  { %v1145_v62 = vadd.f32 %v1144_v43, %v1132_v38 }
 0x2eb   :  { %v1158_v3 = vadd.f32 %v1157_v55, %v1145_v62 }
 0x2ed   :  { %v1171_v34 = vadd.f32 %v2563_v48, %v1158_v3 }
 0x2ef   :  { %v1174_v46 = vmax.f32 %v1171_v34, 0.0 }
 0x2f0   :  { %v1146_v7 = vpop.f32.mrf.mxu0 }
 0x2f1   :  { %v1175_v51 = vpack.c.bf16 %v1174_v46, %v1174_v46 }
 0x2f3   :  { %1708 = vmatmul.msk.bf16.vlgmr.msra.gmra.mxu3 %vm537_vm2, %v1175_v51 }
 0x2f4   :  { %1352 = vmatpush.bf16.msra.mxu3 %v1805_v15 }
 0x2f8   :  { %1353 = vmatpush.bf16.msra.mxu3 %v1804_v41 }
 0x303   :  { %1266 = vmatmul.bf16.vlgmr.msrb.gmra.mxu3 %v1222_v19 }
 0x308   :  { %v1241_v48 = vpop.f32.mrf.mxu0 }
 0x309   :  { %v1242_v8 = vadd.f32 %v1864_v4, %v1241_v48 }
 0x30b   :  { %v1255_v6 = vadd.f32 %v1254_v35, %v1242_v8 }
 0x310   :  { %v1243_v53 = vpop.f32.mrf.mxu0 }
 0x313   :  { %1730 = vmatmul.msk.bf16.vlgmr.msra.gmra.mxu3 %vm537_vm2, %v425_v29 }
 0x320   :  { %v1293_v54 = vpop.f32.mrf.mxu0 }
 0x328   :  { %v1295_v39 = vpop.f32.mrf.mxu0 }
 0x330   :  { %v1411_v56 = vpop.f32.mrf.mxu0 }
 0x338   :  { %v1413_v5 = vpop.f32.mrf.mxu0 }
 0x376   :  { %v1204_v0 = vpop.f32.mrf.mxu3 }
 0x37e   :  { %v1206_v37 = vpop.f32.mrf.mxu3 }
 0x386   :  { %v1267_v50 = vpop.f32.mrf.mxu3 }
 0x387   :  { %v1268_v1 = vadd.f32 %v1267_v50, %v1255_v6 }
 0x389   :  { %v1281_v12 = vadd.f32 %v2567_v52, %v1268_v1  ;;  %v1823_v52 = vld [vmem:[%s2813_s5 + $0x8] sm:$0xff] }
 0x38a   :  { %1483 = vmatpush.bf16.msrb.mxu3 %v1823_v52 }
 0x38b   :  { %v1294_v10 = vadd.f32 %v1293_v54, %v1281_v12 }
 0x38d   :  { %v1297_v25 = vmax.f32 %v1294_v10, 0.0 }
 0x38e   :  { %v1269_v14 = vpop.f32.mrf.mxu3  ;;  %1484 = vmatpush.bf16.msrb.mxu3 %v1822_v30 }
 0x38f   :  { %v1298_v21 = vpack.c.bf16 %v1297_v25, %v1297_v25 }
 0x391   :  { %1721 = vmatmul.msk.bf16.vlgmr.msra.gmra.mxu2 %vm537_vm2, %v1298_v21 }
 0x396   :  { %v1355_v23 = vpop.f32.mrf.mxu3 }
 0x397   :  { %v1356_v28 = vadd.f32 %v1355_v23, %v2451_v58 }
 0x399   :  { %v1443_v13 = vadd.f32 %v2593_v57, %v1356_v28  ;;  %v1412_v57 = vadd.f32 %v1411_v56, %v2747_v40 }
 0x39e   :  { %v1357_v47 = vpop.f32.mrf.mxu3 }
 0x3a1   :  { %1757 = vmatmul.msk.bf16.vlgmr.msrb.gmra.mxu2 %vm537_vm2, %v1080_v49 }
 0x414   :  { %v1327_v36 = vpop.f32.mrf.mxu2 }
 0x41c   :  { %v1329_v32 = vpop.f32.mrf.mxu2 }
 0x424   :  { %v1439_v58 = vpop.f32.mrf.mxu2 }
 0x425   :  { %v1440_v31 = vadd.f32 %v1439_v58, %v1204_v0 }
 0x427   :  { %v1444_v24 = vadd.f32 %v1440_v31, %v1412_v57 }
 0x429   :  { %v1445_v55 = vadd.f32 %v1444_v24, %v1443_v13 }
 0x42b   :  { %v1446_v22 = vadd.f32 %v1445_v55, %v1327_v36 }
 0x42c   :  { %v1441_v20 = vpop.f32.mrf.mxu2 }
 0x42d   :  { %v1451_v18 = vadd.f32 %v1825_v16, %v1446_v22 }
 0x42f   :  { %v1452_v26 = vmax.f32 %v1451_v18, 0.0 }
 0x431   :  { %v1453_v44 = vpack.c.bf16 %v1452_v26, %v1452_v26 }
 0x433   :  { %1766 = vmatmul.msk.bf16.vlgmr.msrb.gmra.mxu3 %vm537_vm2, %v1453_v44 }
 0x4b6   :  { %v1486_v61 = vpop.f32.mrf.mxu3 }
 0x4b7   :  { %v1487_v40 = vadd.f32 %v1826_v42, %v1486_v61 }
 0x4b9   :  { %v1490_v27 = vmax.f32 %v1487_v40, 0.0 }
 0x4bb   :  { %1491 = vst.msk [vmem:[%s2814_s7] sm:$0xff] %vm537_vm2, %v1490_v27 }
 0x4be   :  { %v1488_v9 = vpop.f32.mrf.mxu3 }

</bundles_post_ra>
